<compile_context>
chip_gen: v5e
topology: v5e:2x2
jax: 0.10.0
libtpu: 0.0.40
codegen_flags: <defaults>
</compile_context>

<pallas_src>
import functools

import jax
import jax.numpy as jnp
import numpy as np
from jax.experimental import pallas as pl
from jax.experimental.pallas import tpu as pltpu


# ----------------------------- Pallas kernel ---------------------------------

def _twocnn_kernel(x_ref, v_ref, g_ref, b_ref, col_ref, o_ref,
                   fpad_ref, p_ref, *, H, W, C):
    """Fused weight-norm 3x3 conv + bias + residual for one batch element.

    x_ref   : (1, C, H*W)   input, NCHW with spatial flattened (lane-dense)
    v_ref   : (C, 9*C)      weight-norm direction, col index = (ky*3+kx)*C + ci
    g_ref   : (C, 1)        weight-norm gain (per output channel)
    b_ref   : (C, 1)        conv bias
    col_ref : (1, H*W)      int32, column index n % W for every flat pixel n
    o_ref   : (1, C, H*W)   output (NCHW flattened)
    fpad_ref: (C, H*W + 2*(W+1))  VMEM scratch: zero apron | image | zero apron
    p_ref   : (9*C, H*W)    VMEM scratch: K-packed im2col patches
    """
    HW = H * W
    PAD = W + 1                                   # covers the largest tap shift

    x = x_ref[0].astype(jnp.float32)              # (C, HW)

    # ---- weight norm: w = g * v / ||v||, norm over (Cin, kh, kw) per Cout ----
    v = v_ref[...].astype(jnp.float32)            # (C, 9C)
    inv_norm = jax.lax.rsqrt(jnp.sum(v * v, axis=1, keepdims=True))   # (C, 1)
    w = v * (g_ref[...].astype(jnp.float32) * inv_norm)               # (C, 9C)

    # ---- flat zero-padded image: [zeros(PAD) | x | zeros(PAD)] per channel ----
    fpad_ref[:, :PAD] = jnp.zeros((C, PAD), jnp.float32)
    fpad_ref[:, PAD + HW:] = jnp.zeros((C, PAD), jnp.float32)
    fpad_ref[:, PAD:PAD + HW] = x

    # ---- im2col: tap (ky,kx) is a lane shift by s=(ky-1)*W+(kx-1) of the flat
    #      row; row-boundary wrap is killed by a column-validity mask, image
    #      top/bottom overflow lands in the zero apron automatically. ----------
    col = col_ref[...]                            # (1, HW) int32 = n % W
    for ky in range(3):
        for kx in range(3):
            t = ky * 3 + kx
            s = (ky - 1) * W + (kx - 1)
            cand = fpad_ref[:, PAD + s:PAD + s + HW]          # (C, HW)
            if kx == 0:
                cand = jnp.where(col >= 1, cand, 0.0)         # x-1 must exist
            elif kx == 2:
                cand = jnp.where(col <= W - 2, cand, 0.0)     # x+1 must exist
            p_ref[t * C:(t + 1) * C, :] = cand

    # ---- conv = single (C, 9C) @ (9C, HW) matmul, + bias + residual ----------
    acc = jnp.dot(w, p_ref[...], preferred_element_type=jnp.float32)  # (C, HW)
    acc = acc + b_ref[...].astype(jnp.float32) + x
    o_ref[0] = acc.astype(o_ref.dtype)


# ------------------------------- wrapper --------------------------------------

@jax.jit
def two_cnn_forward(x, v_oihw, g, bias):
    """TwoCNN forward: weight_norm(Conv2d 3x3, pad 1)(x) + x.   x is NCHW."""
    B, C, H, W = x.shape
    HW = H * W
    PAD = W + 1

    # PyTorch OIHW direction (Cout, Cin, 3, 3) -> (Cout, 9*Cin) with
    # column index (ky*3 + kx)*Cin + ci, matching the patch-row ordering.
    v_mat = jnp.transpose(v_oihw, (0, 2, 3, 1)).reshape(C, 9 * C)
    g_col = g.reshape(C, 1)
    b_col = bias.reshape(C, 1)
    col_ids = (jnp.arange(HW, dtype=jnp.int32) % W).reshape(1, HW)
    x_flat = x.reshape(B, C, HW)                  # free reshape (no HBM traffic)

    out_flat = pl.pallas_call(
        functools.partial(_twocnn_kernel, H=H, W=W, C=C),
        out_shape=jax.ShapeDtypeStruct((B, C, HW), x.dtype),
        grid=(B,),
        in_specs=[
            pl.BlockSpec((1, C, HW), lambda i: (i, 0, 0)),   # x (per batch elt)
            pl.BlockSpec((C, 9 * C), lambda i: (0, 0)),      # v (weight direction)
            pl.BlockSpec((C, 1), lambda i: (0, 0)),          # g (weight-norm gain)
            pl.BlockSpec((C, 1), lambda i: (0, 0)),          # bias
            pl.BlockSpec((1, HW), lambda i: (0, 0)),         # column indices
        ],
        out_specs=pl.BlockSpec((1, C, HW), lambda i: (i, 0, 0)),
        scratch_shapes=[
            pltpu.VMEM((C, HW + 2 * PAD), jnp.float32),      # padded flat image
            pltpu.VMEM((9 * C, HW), jnp.float32),            # K-packed patches
        ],
        compiler_params=pltpu.CompilerParams(
            dimension_semantics=("parallel",)),              # megacore on v7x
    )(x_flat, v_mat, g_col, b_col, col_ids)

    return out_flat.reshape(B, C, H, W)


# --------------------------- pure-JAX reference --------------------------------

@jax.jit
def two_cnn_ref(x, v_oihw, g, bias):
    norm = jnp.sqrt(jnp.sum(v_oihw * v_oihw, axis=(1, 2, 3), keepdims=True))
    w = v_oihw * (g.reshape(-1, 1, 1, 1) / norm)             # weight norm (dim=0)
    y = jax.lax.conv_general_dilated(
        x, w, window_strides=(1, 1), padding=((1, 1), (1, 1)),
        dimension_numbers=("NCHW", "OIHW", "NCHW"))
    return y + bias.reshape(1, -1, 1, 1) + x


# ---------------------------------- main ---------------------------------------

if __name__ == "__main__":
    B, C, H, W = 2, 64, 16, 16        # n_feats=64 (module default), small spatial

    key = jax.random.PRNGKey(0)
    k1, k2, k3, k4 = jax.random.split(key, 4)

    x = jax.random.normal(k1, (B, C, H, W), jnp.float32)
    # weight_norm parametrization: direction v (OIHW) and per-out-channel gain g
    v = jax.random.normal(k2, (C, C, 3, 3), jnp.float32) * 0.05
    g = 1.0 + 0.1 * jax.random.normal(k3, (C,), jnp.float32)
    b = 0.05 * jax.random.normal(k4, (C,), jnp.float32)

    out = jax.block_until_ready(two_cnn_forward(x, v, g, b))
    ref = jax.block_until_ready(two_cnn_ref(x, v, g, b))

    np.testing.assert_allclose(np.asarray(out), np.asarray(ref),
                               atol=2e-2, rtol=2e-2)
    assert out.shape == (B, C, H, W) and out.dtype == jnp.float32
    print("KERNEL_OK")
</pallas_src>

<mosaic_0001>
module attributes {stable_mosaic.version = 11 : i64} {
  func.func @_twocnn_kernel(%arg0: i32, %arg1: memref<1x64x256xf32, #tpu.memory_space<vmem>>, %arg2: memref<64x576xf32, #tpu.memory_space<vmem>>, %arg3: memref<64x1xf32, #tpu.memory_space<vmem>>, %arg4: memref<64x1xf32, #tpu.memory_space<vmem>>, %arg5: memref<1x256xi32, #tpu.memory_space<vmem>>, %arg6: memref<1x64x256xf32, #tpu.memory_space<vmem>>, %arg7: memref<64x290xf32, #tpu.memory_space<vmem>>, %arg8: memref<576x256xf32, #tpu.memory_space<vmem>>) attributes {dimension_semantics = [#tpu.dimension_semantics<parallel>], iteration_bounds = array<i64: 2>, scalar_prefetch = 0 : i64, scratch_operands = 2 : i64, tpu.core_type = #tpu.core_type<tc>, window_params = [{transform_indices = @transform_0, window_bounds = array<i64: 1, 64, 256>}, {pipeline_mode = #tpu.pipeline_mode<synchronous>, transform_indices = @transform_1, window_bounds = array<i64: 64, 576>}, {pipeline_mode = #tpu.pipeline_mode<synchronous>, transform_indices = @transform_2, window_bounds = array<i64: 64, 1>}, {pipeline_mode = #tpu.pipeline_mode<synchronous>, transform_indices = @transform_3, window_bounds = array<i64: 64, 1>}, {pipeline_mode = #tpu.pipeline_mode<synchronous>, transform_indices = @transform_4, window_bounds = array<i64: 1, 256>}, {transform_indices = @transform_5, window_bounds = array<i64: 1, 64, 256>}]} {
    %c0 = arith.constant 0 : index
    %c0_0 = arith.constant 0 : index
    %c0_1 = arith.constant 0 : index
    %0 = vector.load %arg1[%c0, %c0_0, %c0_1] : memref<1x64x256xf32, #tpu.memory_space<vmem>>, vector<1x64x256xf32>
    %1 = vector.shape_cast %0 : vector<1x64x256xf32> to vector<64x256xf32>
    %c0_2 = arith.constant 0 : index
    %c0_3 = arith.constant 0 : index
    %2 = vector.load %arg2[%c0_2, %c0_3] : memref<64x576xf32, #tpu.memory_space<vmem>>, vector<64x576xf32>
    %3 = arith.mulf %2, %2 : vector<64x576xf32>
    %cst = arith.constant dense<0.000000e+00> : vector<64xf32>
    %4 = vector.multi_reduction <add>, %3, %cst [1] : vector<64x576xf32> to vector<64xf32>
    %5 = vector.shape_cast %4 : vector<64xf32> to vector<64x1xf32>
    %6 = math.rsqrt %5 : vector<64x1xf32>
    %c0_4 = arith.constant 0 : index
    %c0_5 = arith.constant 0 : index
    %7 = vector.load %arg3[%c0_4, %c0_5] : memref<64x1xf32, #tpu.memory_space<vmem>>, vector<64x1xf32>
    %8 = arith.mulf %7, %6 : vector<64x1xf32>
    %9 = vector.broadcast %8 : vector<64x1xf32> to vector<64x576xf32>
    %10 = arith.mulf %2, %9 : vector<64x576xf32>
    %cst_6 = arith.constant 0.000000e+00 : f32
    %11 = vector.broadcast %cst_6 : f32 to vector<64x17xf32>
    %c0_7 = arith.constant 0 : index
    %c0_8 = arith.constant 0 : index
    %12 = vector.load %arg7[%c0_7, %c0_8] : memref<64x290xf32, #tpu.memory_space<vmem>>, vector<64x17xf32>
    tpu.vector_store %arg7[%c0_7, %c0_8], %11 {strides = array<i32>} : memref<64x290xf32, #tpu.memory_space<vmem>>, vector<64x17xf32>,
    %cst_9 = arith.constant 0.000000e+00 : f32
    %13 = vector.broadcast %cst_9 : f32 to vector<64x17xf32>
    %c0_10 = arith.constant 0 : index
    %c273 = arith.constant 273 : index
    %14 = vector.load %arg7[%c0_10, %c273] : memref<64x290xf32, #tpu.memory_space<vmem>>, vector<64x17xf32>
    tpu.vector_store %arg7[%c0_10, %c273], %13 {strides = array<i32>} : memref<64x290xf32, #tpu.memory_space<vmem>>, vector<64x17xf32>,
    %c0_11 = arith.constant 0 : index
    %c17 = arith.constant 17 : index
    %15 = vector.load %arg7[%c0_11, %c17] : memref<64x290xf32, #tpu.memory_space<vmem>>, vector<64x256xf32>
    tpu.vector_store %arg7[%c0_11, %c17], %1 {strides = array<i32>} : memref<64x290xf32, #tpu.memory_space<vmem>>, vector<64x256xf32>,
    %c0_12 = arith.constant 0 : index
    %c0_13 = arith.constant 0 : index
    %16 = vector.load %arg5[%c0_12, %c0_13] : memref<1x256xi32, #tpu.memory_space<vmem>>, vector<1x256xi32>
    %c0_14 = arith.constant 0 : index
    %c0_15 = arith.constant 0 : index
    %17 = vector.load %arg7[%c0_14, %c0_15] : memref<64x290xf32, #tpu.memory_space<vmem>>, vector<64x256xf32>
    %c1_i32 = arith.constant 1 : i32
    %18 = vector.broadcast %c1_i32 : i32 to vector<1x256xi32>
    %19 = arith.cmpi sge, %16, %18 : vector<1x256xi32>
    %cst_16 = arith.constant 0.000000e+00 : f32
    %20 = vector.shape_cast %19 : vector<1x256xi1> to vector<1x256xi1>
    %21 = vector.broadcast %20 : vector<1x256xi1> to vector<64x256xi1>
    %22 = vector.broadcast %cst_16 : f32 to vector<64x256xf32>
    %23 = arith.select %21, %17, %22 : vector<64x256xi1>, vector<64x256xf32>
    %c0_17 = arith.constant 0 : index
    %c0_18 = arith.constant 0 : index
    %24 = vector.load %arg8[%c0_17, %c0_18] : memref<576x256xf32, #tpu.memory_space<vmem>>, vector<64x256xf32>
    tpu.vector_store %arg8[%c0_17, %c0_18], %23 {strides = array<i32>} : memref<576x256xf32, #tpu.memory_space<vmem>>, vector<64x256xf32>,
    %c0_19 = arith.constant 0 : index
    %c1 = arith.constant 1 : index
    %25 = vector.load %arg7[%c0_19, %c1] : memref<64x290xf32, #tpu.memory_space<vmem>>, vector<64x256xf32>
    %c64 = arith.constant 64 : index
    %c0_20 = arith.constant 0 : index
    %26 = vector.load %arg8[%c64, %c0_20] : memref<576x256xf32, #tpu.memory_space<vmem>>, vector<64x256xf32>
    tpu.vector_store %arg8[%c64, %c0_20], %25 {strides = array<i32>} : memref<576x256xf32, #tpu.memory_space<vmem>>, vector<64x256xf32>,
    %c0_21 = arith.constant 0 : index
    %c2 = arith.constant 2 : index
    %27 = vector.load %arg7[%c0_21, %c2] : memref<64x290xf32, #tpu.memory_space<vmem>>, vector<64x256xf32>
    %c14_i32 = arith.constant 14 : i32
    %28 = vector.broadcast %c14_i32 : i32 to vector<1x256xi32>
    %29 = arith.cmpi sle, %16, %28 : vector<1x256xi32>
    %cst_22 = arith.constant 0.000000e+00 : f32
    %30 = vector.shape_cast %29 : vector<1x256xi1> to vector<1x256xi1>
    %31 = vector.broadcast %30 : vector<1x256xi1> to vector<64x256xi1>
    %32 = vector.broadcast %cst_22 : f32 to vector<64x256xf32>
    %33 = arith.select %31, %27, %32 : vector<64x256xi1>, vector<64x256xf32>
    %c128 = arith.constant 128 : index
    %c0_23 = arith.constant 0 : index
    %34 = vector.load %arg8[%c128, %c0_23] : memref<576x256xf32, #tpu.memory_space<vmem>>, vector<64x256xf32>
    tpu.vector_store %arg8[%c128, %c0_23], %33 {strides = array<i32>} : memref<576x256xf32, #tpu.memory_space<vmem>>, vector<64x256xf32>,
    %c0_24 = arith.constant 0 : index
    %c16 = arith.constant 16 : index
    %35 = vector.load %arg7[%c0_24, %c16] : memref<64x290xf32, #tpu.memory_space<vmem>>, vector<64x256xf32>
    %c1_i32_25 = arith.constant 1 : i32
    %36 = vector.broadcast %c1_i32_25 : i32 to vector<1x256xi32>
    %37 = arith.cmpi sge, %16, %36 : vector<1x256xi32>
    %cst_26 = arith.constant 0.000000e+00 : f32
    %38 = vector.shape_cast %37 : vector<1x256xi1> to vector<1x256xi1>
    %39 = vector.broadcast %38 : vector<1x256xi1> to vector<64x256xi1>
    %40 = vector.broadcast %cst_26 : f32 to vector<64x256xf32>
    %41 = arith.select %39, %35, %40 : vector<64x256xi1>, vector<64x256xf32>
    %c192 = arith.constant 192 : index
    %c0_27 = arith.constant 0 : index
    %42 = vector.load %arg8[%c192, %c0_27] : memref<576x256xf32, #tpu.memory_space<vmem>>, vector<64x256xf32>
    tpu.vector_store %arg8[%c192, %c0_27], %41 {strides = array<i32>} : memref<576x256xf32, #tpu.memory_space<vmem>>, vector<64x256xf32>,
    %c0_28 = arith.constant 0 : index
    %c17_29 = arith.constant 17 : index
    %43 = vector.load %arg7[%c0_28, %c17_29] : memref<64x290xf32, #tpu.memory_space<vmem>>, vector<64x256xf32>
    %c256 = arith.constant 256 : index
    %c0_30 = arith.constant 0 : index
    %44 = vector.load %arg8[%c256, %c0_30] : memref<576x256xf32, #tpu.memory_space<vmem>>, vector<64x256xf32>
    tpu.vector_store %arg8[%c256, %c0_30], %43 {strides = array<i32>} : memref<576x256xf32, #tpu.memory_space<vmem>>, vector<64x256xf32>,
    %c0_31 = arith.constant 0 : index
    %c18 = arith.constant 18 : index
    %45 = vector.load %arg7[%c0_31, %c18] : memref<64x290xf32, #tpu.memory_space<vmem>>, vector<64x256xf32>
    %c14_i32_32 = arith.constant 14 : i32
    %46 = vector.broadcast %c14_i32_32 : i32 to vector<1x256xi32>
    %47 = arith.cmpi sle, %16, %46 : vector<1x256xi32>
    %cst_33 = arith.constant 0.000000e+00 : f32
    %48 = vector.shape_cast %47 : vector<1x256xi1> to vector<1x256xi1>
    %49 = vector.broadcast %48 : vector<1x256xi1> to vector<64x256xi1>
    %50 = vector.broadcast %cst_33 : f32 to vector<64x256xf32>
    %51 = arith.select %49, %45, %50 : vector<64x256xi1>, vector<64x256xf32>
    %c320 = arith.constant 320 : index
    %c0_34 = arith.constant 0 : index
    %52 = vector.load %arg8[%c320, %c0_34] : memref<576x256xf32, #tpu.memory_space<vmem>>, vector<64x256xf32>
    tpu.vector_store %arg8[%c320, %c0_34], %51 {strides = array<i32>} : memref<576x256xf32, #tpu.memory_space<vmem>>, vector<64x256xf32>,
    %c0_35 = arith.constant 0 : index
    %c32 = arith.constant 32 : index
    %53 = vector.load %arg7[%c0_35, %c32] : memref<64x290xf32, #tpu.memory_space<vmem>>, vector<64x256xf32>
    %c1_i32_36 = arith.constant 1 : i32
    %54 = vector.broadcast %c1_i32_36 : i32 to vector<1x256xi32>
    %55 = arith.cmpi sge, %16, %54 : vector<1x256xi32>
    %cst_37 = arith.constant 0.000000e+00 : f32
    %56 = vector.shape_cast %55 : vector<1x256xi1> to vector<1x256xi1>
    %57 = vector.broadcast %56 : vector<1x256xi1> to vector<64x256xi1>
    %58 = vector.broadcast %cst_37 : f32 to vector<64x256xf32>
    %59 = arith.select %57, %53, %58 : vector<64x256xi1>, vector<64x256xf32>
    %c384 = arith.constant 384 : index
    %c0_38 = arith.constant 0 : index
    %60 = vector.load %arg8[%c384, %c0_38] : memref<576x256xf32, #tpu.memory_space<vmem>>, vector<64x256xf32>
    tpu.vector_store %arg8[%c384, %c0_38], %59 {strides = array<i32>} : memref<576x256xf32, #tpu.memory_space<vmem>>, vector<64x256xf32>,
    %c0_39 = arith.constant 0 : index
    %c33 = arith.constant 33 : index
    %61 = vector.load %arg7[%c0_39, %c33] : memref<64x290xf32, #tpu.memory_space<vmem>>, vector<64x256xf32>
    %c448 = arith.constant 448 : index
    %c0_40 = arith.constant 0 : index
    %62 = vector.load %arg8[%c448, %c0_40] : memref<576x256xf32, #tpu.memory_space<vmem>>, vector<64x256xf32>
    tpu.vector_store %arg8[%c448, %c0_40], %61 {strides = array<i32>} : memref<576x256xf32, #tpu.memory_space<vmem>>, vector<64x256xf32>,
    %c0_41 = arith.constant 0 : index
    %c34 = arith.constant 34 : index
    %63 = vector.load %arg7[%c0_41, %c34] : memref<64x290xf32, #tpu.memory_space<vmem>>, vector<64x256xf32>
    %c14_i32_42 = arith.constant 14 : i32
    %64 = vector.broadcast %c14_i32_42 : i32 to vector<1x256xi32>
    %65 = arith.cmpi sle, %16, %64 : vector<1x256xi32>
    %cst_43 = arith.constant 0.000000e+00 : f32
    %66 = vector.shape_cast %65 : vector<1x256xi1> to vector<1x256xi1>
    %67 = vector.broadcast %66 : vector<1x256xi1> to vector<64x256xi1>
    %68 = vector.broadcast %cst_43 : f32 to vector<64x256xf32>
    %69 = arith.select %67, %63, %68 : vector<64x256xi1>, vector<64x256xf32>
    %c512 = arith.constant 512 : index
    %c0_44 = arith.constant 0 : index
    %70 = vector.load %arg8[%c512, %c0_44] : memref<576x256xf32, #tpu.memory_space<vmem>>, vector<64x256xf32>
    tpu.vector_store %arg8[%c512, %c0_44], %69 {strides = array<i32>} : memref<576x256xf32, #tpu.memory_space<vmem>>, vector<64x256xf32>,
    %c0_45 = arith.constant 0 : index
    %c0_46 = arith.constant 0 : index
    %71 = vector.load %arg8[%c0_45, %c0_46] : memref<576x256xf32, #tpu.memory_space<vmem>>, vector<576x256xf32>
    %cst_47 = arith.constant dense<0.000000e+00> : vector<64x256xf32>
    %72 = tpu.matmul %10, %71, %cst_47 {dimension_numbers = #tpu.dot_dimension_numbers<[1], [0], [0], [1], [0, 0, 1, 1], [], []>} : vector<64x576xf32>, vector<576x256xf32>, vector<64x256xf32> -> vector<64x256xf32>
    %c0_48 = arith.constant 0 : index
    %c0_49 = arith.constant 0 : index
    %73 = vector.load %arg4[%c0_48, %c0_49] : memref<64x1xf32, #tpu.memory_space<vmem>>, vector<64x1xf32>
    %74 = vector.broadcast %73 : vector<64x1xf32> to vector<64x256xf32>
    %75 = arith.addf %72, %74 : vector<64x256xf32>
    %76 = arith.addf %75, %1 : vector<64x256xf32>
    %c0_50 = arith.constant 0 : index
    %c0_51 = arith.constant 0 : index
    %c0_52 = arith.constant 0 : index
    %77 = vector.load %arg6[%c0_50, %c0_51, %c0_52] : memref<1x64x256xf32, #tpu.memory_space<vmem>>, vector<1x64x256xf32>
    %78 = vector.shape_cast %77 : vector<1x64x256xf32> to vector<64x256xf32>
    %79 = vector.shape_cast %76 : vector<64x256xf32> to vector<1x64x256xf32>
    tpu.vector_store %arg6[%c0_50, %c0_51, %c0_52], %79 {strides = array<i32>} : memref<1x64x256xf32, #tpu.memory_space<vmem>>, vector<1x64x256xf32>,
    return
  }
  func.func @transform_0(%arg0: i32) -> (i32, i32, i32) {
    %c0_i32 = arith.constant 0 : i32
    %c0_i32_0 = arith.constant 0 : i32
    %c0_i32_1 = arith.constant 0 : i32
    return %arg0, %c0_i32, %c0_i32_0 : i32, i32, i32
  }
  func.func @transform_1(%arg0: i32) -> (i32, i32) {
    %c0_i32 = arith.constant 0 : i32
    %c0_i32_0 = arith.constant 0 : i32
    %c0_i32_1 = arith.constant 0 : i32
    return %c0_i32, %c0_i32_0 : i32, i32
  }
  func.func @transform_2(%arg0: i32) -> (i32, i32) {
    %c0_i32 = arith.constant 0 : i32
    %c0_i32_0 = arith.constant 0 : i32
    %c0_i32_1 = arith.constant 0 : i32
    return %c0_i32, %c0_i32_0 : i32, i32
  }
  func.func @transform_3(%arg0: i32) -> (i32, i32) {
    %c0_i32 = arith.constant 0 : i32
    %c0_i32_0 = arith.constant 0 : i32
    %c0_i32_1 = arith.constant 0 : i32
    return %c0_i32, %c0_i32_0 : i32, i32
  }
  func.func @transform_4(%arg0: i32) -> (i32, i32) {
    %c0_i32 = arith.constant 0 : i32
    %c0_i32_0 = arith.constant 0 : i32
    %c0_i32_1 = arith.constant 0 : i32
    return %c0_i32, %c0_i32_0 : i32, i32
  }
  func.func @transform_5(%arg0: i32) -> (i32, i32, i32) {
    %c0_i32 = arith.constant 0 : i32
    %c0_i32_0 = arith.constant 0 : i32
    %c0_i32_1 = arith.constant 0 : i32
    return %arg0, %c0_i32, %c0_i32_0 : i32, i32, i32
  }
}

</mosaic_0001>

<bundles_post_ra>
// kernel: two_cnn_forward.1
= control target key start
LH: loop header
LB: loop body
LE: loop exit
PB: predicated region body
PF: predicated region fallthrough
CT: control target
= control target key end

     0   :  { %s3170_s18 = smov 0   ;;  %s5351_s0 = inlined_call_operand.vmem [shape: f32[2,64,256], index: 0, kind: input, shape index: {}]   ;;  %s5352_s1 = inlined_call_operand.vmem [shape: f32[64,576], index: 1, kind: input, shape index: {}]   ;;  %s5353_s2 = inlined_call_operand.vmem [shape: f32[64,1], index: 2, kind: input, shape index: {}]   ;;  %s5354_s3 = inlined_call_operand.vmem [shape: f32[64,1], index: 3, kind: input, shape index: {}]   ;;  %s5355_s4 = inlined_call_operand.vmem [shape: s32[1,256], index: 4, kind: input, shape index: {}]   ;;  %s5356_s5 = inlined_call_operand.vmem [shape: f32[2,64,256], index: 5, kind: output, shape index: {}]  }
   0x1 LB: > { %s2691_s19 = sadd.s32 4294967295, %s3127_s18   ;;  %p2695_p0 = scmp.ge.s32.totalorder %s3127_s18, 1  ;;  %s3127_s18 = sphi %s3170_s18, %s15_s18  }
   0x2   : > { %p187_p1 = scmp.lt.s32.totalorder %s3127_s18, 3 }
   0x4   : > { %p188_p2 = pnand %p2695_p0, %p187_p1 }
   0x6   : > { %191 = sbr.rel (%p188_p2) target bundleno = 935 (0x3a7), region = 40 }
   0xb   : > { %v251_v0 = vld [vmem:[%s5352_s1 + $0x50] sm:$0xff]  ;;  %v252_v1 = vld [vmem:[%s5352_s1 + $0x58] sm:$0xff]  ;;  %v253_v2 = vld [vmem:[%s5352_s1 + $0x60] sm:$0xff]  ;;  %vm324_vm0 = vcmask 523264   ;;  %p215_p3 = scmp.lt.s32.totalorder %s2691_s19, 1  ;;  %s3129_s10 = smov 17  }
   0xc   : > { %v254_v3 = vld [vmem:[%s5352_s1 + $0x68] sm:$0xff]  ;;  %v255_v4 = vld [vmem:[%s5352_s1 + $0x70] sm:$0xff]  ;;  %v291_v5 = vmul.f32 %v251_v0, %v251_v0  ;;  %v292_v6 = vmul.f32 %v252_v1, %v252_v1  ;;  %v293_v7 = vmul.f32 %v253_v2, %v253_v2  ;;  %v241_v8 = vld [vmem:[%s5352_s1] sm:$0xff]  ;;  %vm554_vm1 = vcmask 138240   ;;  %s3131_s11 = smov 126   ;;  %s3132_s12 = smov 127  }
   0xd   : > { %v295_v9 = vmul.f32 %v255_v4, %v255_v4  ;;  %v242_v10 = vld [vmem:[%s5352_s1 + $0x8] sm:$0xff]  ;;  %v243_v11 = vld [vmem:[%s5352_s1 + $0x10] sm:$0xff]  ;;  %v244_v12 = vld [vmem:[%s5352_s1 + $0x18] sm:$0xff]  ;;  %v281_v13 = vmul.f32 %v241_v8, %v241_v8  ;;  %v294_v14 = vmul.f32 %v254_v3, %v254_v3  ;;  %s5498_s19 = smov (!%p215_p3, %s2691_s19), 1  ;;  %vm563_vm2 = vcmask 277640   ;;  %s3136_s24 = smov 110  }
   0xe   : > { %v336_v15 = vadd.f32 %v292_v6, %v291_v5  ;;  %v245_v16 = vld [vmem:[%s5352_s1 + $0x20] sm:$0xff]  ;;  %v282_v17 = vmul.f32 %v242_v10, %v242_v10  ;;  %v283_v18 = vmul.f32 %v243_v11, %v243_v11  ;;  %v256_v19 = vld [vmem:[%s5352_s1 + $0x78] sm:$0xff]  ;;  %v284_v21 = vmul.f32 %v244_v12, %v244_v12  ;;  %v258_v23 = vld [vmem:[%s5352_s1 + $0x88] sm:$0xff]  ;;  %s2718_s6 = sshll.u32 %s5498_s19, 7  ;;  %s3137_s29 = smov 95  }
   0xf   : > { %v257_v20 = vld [vmem:[%s5352_s1 + $0x80] sm:$0xff]  ;;  %v285_v22 = vmul.f32 %v245_v16, %v245_v16  ;;  %v259_v24 = vld [vmem:[%s5352_s1 + $0x90] sm:$0xff]  ;;  %v260_v25 = vld [vmem:[%s5352_s1 + $0x98] sm:$0xff]  ;;  %v296_v26 = vmul.f32 %v256_v19, %v256_v19  ;;  %v339_v29 = vsel %vm324_vm0, %v295_v9, 0.0  ;;  %v298_v31 = vmul.f32 %v258_v23, %v258_v23  ;;  %s3322_s9 = scalar_lea.vmem %s5351_s0, %s2718_s6  ;;  %s3138_s30 = smov 96  }
  0x10   : > { %v297_v27 = vmul.f32 %v257_v20, %v257_v20  ;;  %v337_v28 = vadd.f32 %v336_v15, %v293_v7  ;;  %v321_v30 = vadd.f32 %v282_v17, %v281_v13  ;;  %v246_v32 = vld [vmem:[%s5352_s1 + $0x28] sm:$0xff]  ;;  %v247_v33 = vld [vmem:[%s5352_s1 + $0x30] sm:$0xff]  ;;  %v248_v34 = vld [vmem:[%s5352_s1 + $0x38] sm:$0xff]  ;;  %v299_v35 = vmul.f32 %v259_v24, %v259_v24  ;;  %s3139_s7 = smov 94   ;;  %s5256_s8 = scalar_lea.vmem %s5356_s5, %s2718_s6 }
  0x11   : > { %v300_v36 = vmul.f32 %v260_v25, %v260_v25  ;;  %v249_v38 = vld [vmem:[%s5352_s1 + $0x40] sm:$0xff]  ;;  %v250_v39 = vld [vmem:[%s5352_s1 + $0x48] sm:$0xff]  ;;  %v286_v40 = vmul.f32 %v246_v32, %v246_v32  ;;  %v287_v44 = vmul.f32 %v247_v33, %v247_v33  ;;  %v288_v45 = vmul.f32 %v248_v34, %v248_v34  ;;  %v263_v47 = vld [vmem:[%s5352_s1 + $0xb0] sm:$0xff] }
  0x12   : > { %v343_v37 = vadd.f32 %v297_v27, %v296_v26  ;;  %v261_v41 = vld [vmem:[%s5352_s1 + $0xa0] sm:$0xff]  ;;  %v338_v42 = vadd.f32 %v337_v28, %v294_v14  ;;  %v322_v43 = vadd.f32 %v321_v30, %v283_v18  ;;  %v262_v46 = vld [vmem:[%s5352_s1 + $0xa8] sm:$0xff]  ;;  %v325_v48 = vsel %vm324_vm0, %v285_v22, 0.0  ;;  %v264_v56 = vld [vmem:[%s5352_s1 + $0xb8] sm:$0xff] }
  0x13   : > { %v289_v50 = vmul.f32 %v249_v38, %v249_v38  ;;  %v290_v51 = vmul.f32 %v250_v39, %v250_v39  ;;  %v265_v52 = vld [vmem:[%s5352_s1 + $0xc0] sm:$0xff]  ;;  %v329_v55 = vadd.f32 %v287_v44, %v286_v40  ;;  %v301_v57 = vmul.f32 %v261_v41, %v261_v41  ;;  %v276_v58 = vld [vmem:[%s5352_s1 + $0x118] sm:$0xff]  ;;  %v278_v0 = vld [vmem:[%s5352_s1 + $0x128] sm:$0xff] }
  0x14   : > { %v344_v49 = vadd.f32 %v343_v37, %v298_v31  ;;  %v340_v53 = vadd.f32 %v339_v29, %v338_v42  ;;  %v323_v54 = vadd.f32 %v322_v43, %v284_v21  ;;  %v277_v59 = vld [vmem:[%s5352_s1 + $0x120] sm:$0xff]  ;;  %v346_v61 = vsel %vm324_vm0, %v300_v36, 0.0  ;;  %v279_v4 = vld [vmem:[%s5352_s1 + $0x130] sm:$0xff]  ;;  %v280_v8 = vld [vmem:[%s5352_s1 + $0x138] sm:$0xff] }
  0x15   : > { %v302_v62 = vmul.f32 %v262_v46, %v262_v46  ;;  %v303_v63 = vmul.f32 %v263_v47, %v263_v47  ;;  %v330_v2 = vadd.f32 %v329_v55, %v288_v45  ;;  %v305_v3 = vmul.f32 %v265_v52, %v265_v52  ;;  %v271_v5 = vld [vmem:[%s5352_s1 + $0xf0] sm:$0xff]  ;;  %v272_v11 = vld [vmem:[%s5352_s1 + $0xf8] sm:$0xff]  ;;  %v273_v12 = vld [vmem:[%s5352_s1 + $0x100] sm:$0xff] }
  0x16   : > { %v345_v60 = vadd.f32 %v344_v49, %v299_v35  ;;  %341 = vadd.xlane.f32.xlu1 %v340_v53  ;;  %v326_v1 = vadd.f32 %v325_v48, %v323_v54  ;;  %v304_v6 = vmul.f32 %v264_v56, %v264_v56  ;;  %v316_v9 = vmul.f32 %v276_v58, %v276_v58  ;;  %v274_v17 = vld [vmem:[%s5352_s1 + $0x108] sm:$0xff]  ;;  %v267_v23 = vld [vmem:[%s5352_s1 + $0xd0] sm:$0xff]  ;;  %v268_v24 = vld [vmem:[%s5352_s1 + $0xd8] sm:$0xff] }
  0x17   : > { %v350_v7 = vadd.f32 %v302_v62, %v301_v57  ;;  %v317_v10 = vmul.f32 %v277_v59, %v277_v59  ;;  %v331_v14 = vadd.f32 %v330_v2, %v289_v50  ;;  %v332_v15 = vsel %vm324_vm0, %v290_v51, 0.0  ;;  %v3287_v22 = vld [vmem:[%s5352_s1 + $0xc8] sm:$0xff]  ;;  %v275_v27 = vld [vmem:[%s5352_s1 + $0x110] sm:$0xff]  ;;  %v269_v34 = vld [vmem:[%s5352_s1 + $0xe0] sm:$0xff] }
  0x18   : > { %327 = vadd.xlane.f32.xlu0 %v326_v1  ;;  %v347_v13 = vadd.f32 %v346_v61, %v345_v60  ;;  %v318_v16 = vmul.f32 %v278_v0, %v278_v0  ;;  %v319_v19 = vmul.f32 %v279_v4, %v279_v4  ;;  %v311_v21 = vmul.f32 %v271_v5, %v271_v5  ;;  %v270_v35 = vld [vmem:[%s5352_s1 + $0xe8] sm:$0xff]  ;;  %v225_v56 = vld [vmem:[%s3322_s9] sm:$0xff]  ;;  %v227_v57 = vld [vmem:[%s3322_s9 + $0x10] sm:$0xff] }
  0x19   : > { %v351_v18 = vadd.f32 %v350_v7, %v303_v63  ;;  %v371_v20 = vadd.f32 %v317_v10, %v316_v9  ;;  %v353_v25 = vsel %vm324_vm0, %v305_v3, 0.0  ;;  %v320_v26 = vmul.f32 %v280_v8, %v280_v8  ;;  %v226_v58 = vld [vmem:[%s3322_s9 + $0x8] sm:$0xff]  ;;  %v228_v59 = vld [vmem:[%s3322_s9 + $0x18] sm:$0xff]  ;;  %v229_v61 = vld [vmem:[%s3322_s9 + $0x20] sm:$0xff] }
  0x1a   : > { %v312_v28 = vmul.f32 %v272_v11, %v272_v11  ;;  %v313_v29 = vmul.f32 %v273_v12, %v273_v12  ;;  %v333_v30 = vadd.f32 %v332_v15, %v331_v14  ;;  %v314_v33 = vmul.f32 %v274_v17, %v274_v17  ;;  %v230_v60 = vld [vmem:[%s3322_s9 + $0x28] sm:$0xff]  ;;  %v231_v62 = vld [vmem:[%s3322_s9 + $0x30] sm:$0xff]  ;;  %v233_v63 = vld [vmem:[%s3322_s9 + $0x40] sm:$0xff] }
  0x1b   : > { %v352_v31 = vadd.f32 %v351_v18, %v304_v6  ;;  %v372_v32 = vadd.f32 %v371_v20, %v318_v16  ;;  %v306_v37 = vmul.f32 %v3287_v22, %v3287_v22  ;;  %v307_v38 = vmul.f32 %v267_v23, %v267_v23  ;;  %v232_v0 = vld [vmem:[%s3322_s9 + $0x38] sm:$0xff]  ;;  %v234_v1 = vld [vmem:[%s3322_s9 + $0x48] sm:$0xff]  ;;  %v235_v3 = vld [vmem:[%s3322_s9 + $0x50] sm:$0xff] }
  0x1c   : > { %v364_v36 = vadd.f32 %v312_v28, %v311_v21  ;;  %v308_v39 = vmul.f32 %v268_v24, %v268_v24  ;;  %v315_v42 = vmul.f32 %v275_v27, %v275_v27  ;;  %v309_v44 = vmul.f32 %v269_v34, %v269_v34  ;;  %v236_v2 = vld [vmem:[%s3322_s9 + $0x58] sm:$0xff]  ;;  %v237_v4 = vld [vmem:[%s3322_s9 + $0x60] sm:$0xff]  ;;  %v239_v5 = vld [vmem:[%s3322_s9 + $0x70] sm:$0xff] }
  0x1d   : > { %v354_v40 = vadd.f32 %v353_v25, %v352_v31  ;;  %v373_v41 = vadd.f32 %v372_v32, %v319_v19  ;;  %v310_v45 = vmul.f32 %v270_v35, %v270_v35  ;;  %v357_v46 = vadd.f32 %v307_v38, %v306_v37  ;;  %v238_v6 = vld [vmem:[%s3322_s9 + $0x68] sm:$0xff]  ;;  %v240_v7 = vld [vmem:[%s3322_s9 + $0x78] sm:$0xff]  ;;  %v3442_v38 = vld [vmem:[%s5355_s4] sm:$0x3] }
  0x1e   : > { %348 = vadd.xlane.f32.xlu1 %v347_v13  ;;  %v365_v43 = vadd.f32 %v364_v36, %v313_v29  ;;  %v374_v47 = vsel %vm324_vm0, %v320_v26, 0.0  ;;  %v367_v50 = vsel %vm324_vm0, %v315_v42, 0.0  ;;  %v3130_v8 = vmov 0.0  }
  0x1f   : > { %355 = vadd.xlane.f32.xlu2 %v354_v40  ;;  %v358_v49 = vadd.f32 %v357_v46, %v308_v39  ;;  %v360_v51 = vsel %vm324_vm0, %v310_v45, 0.0  ;;  %v375_v52 = vadd.f32 %v374_v47, %v373_v41  ;;  %564 = vst.msk [vmem:[#allocation2 + $0x10] sm:$0xff] %vm563_vm2, %v3130_v8  ;;  %vm652_vm3 = vcmask 1047688  }
  0x20   : > { %334 = vadd.xlane.f32.xlu0 %v333_v30  ;;  %v366_v48 = vadd.f32 %v365_v43, %v314_v33  ;;  %555 = vst.msk [vmem:[#allocation2] sm:$0xff] %vm554_vm1, %v3130_v8  ;;  %vm901_vm4 = vcmp.le.s32.totalorder %v3442_v38, 14  ;;  %v5357_v40 = vmov 0  }
  0x21   : > { %v359_v53 = vadd.f32 %v358_v49, %v309_v44  ;;  %556 = vst.msk [vmem:[#allocation2 + $0x18] sm:$0xff] %vm554_vm1, %v3130_v8  ;;  %2927 = vset.pattern.permute.xlu2 %v5357_v40  ;;  %2928 = vset.pattern.permute.xlu0 %v5357_v40  ;;  %v3450_v41 = vsel %vm901_vm4, 1, %v5357_v40 }
  0x22   : > { %v368_v54 = vadd.f32 %v367_v50, %v366_v48  ;;  %557 = vst.msk [vmem:[#allocation2 + $0x30] sm:$0xff] %vm554_vm1, %v3130_v8  ;;  %2929 = vset.pattern.permute.xlu1 %v5357_v40 }
  0x23   : > { %v361_v55 = vadd.f32 %v360_v51, %v359_v53  ;;  %558 = vst.msk [vmem:[#allocation2 + $0x48] sm:$0xff] %vm554_vm1, %v3130_v8 }
  0x24   : > { %559 = vst.msk [vmem:[#allocation2 + $0x60] sm:$0xff] %vm554_vm1, %v3130_v8 }
  0x25   : > { %560 = vst.msk [vmem:[#allocation2 + $0x78] sm:$0xff] %vm554_vm1, %v3130_v8 }
  0x26   : > { %376 = vadd.xlane.f32.xlu1 %v375_v52  ;;  %561 = vst.msk [vmem:[#allocation2 + $0x90] sm:$0xff] %vm554_vm1, %v3130_v8 }
  0x27   : > { %362 = vadd.xlane.f32.xlu2 %v361_v55  ;;  %562 = vst.msk [vmem:[#allocation2 + $0xa8] sm:$0xff] %vm554_vm1, %v3130_v8 }
  0x28   : > { %369 = vadd.xlane.f32.xlu0 %v368_v54  ;;  %565 = vst.msk [vmem:[#allocation2 + $0x28] sm:$0xff] %vm563_vm2, %v3130_v8 }
  0x29   : > { %566 = vst.msk [vmem:[#allocation2 + $0x40] sm:$0xff] %vm563_vm2, %v3130_v8 }
  0x2a   : > { %567 = vst.msk [vmem:[#allocation2 + $0x58] sm:$0xff] %vm563_vm2, %v3130_v8 }
  0x2b   : > { %568 = vst.msk [vmem:[#allocation2 + $0x70] sm:$0xff] %vm563_vm2, %v3130_v8 }
  0x2c   : > { %569 = vst.msk [vmem:[#allocation2 + $0x88] sm:$0xff] %vm563_vm2, %v3130_v8 }
  0x2d   : > { %570 = vst.msk [vmem:[#allocation2 + $0xa0] sm:$0xff] %vm563_vm2, %v3130_v8 }
  0x2e   : > { %571 = vst.msk [vmem:[#allocation2 + $0xb8] sm:$0xff] %vm563_vm2, %v3130_v8 }
  0x2f   : > { %5391 = vst [vmem:[#allocation4_spill] sm:$0xff] %v3450_v41 }
  0x3c   : > { %588 = vrot.lane.b32.xlu0 %v225_v56, %s3129_s10 }
  0x3f   : > { %592 = vrot.lane.b32.xlu1 %v227_v57, %s3129_s10  ;;  %590 = vrot.lane.b32.xlu2 %v226_v58, %s3129_s10 }
  0x44   : > { %594 = vrot.lane.b32.xlu0 %v228_v59, %s3129_s10 }
  0x47   : > { %598 = vrot.lane.b32.xlu1 %v230_v60, %s3129_s10  ;;  %596 = vrot.lane.b32.xlu2 %v229_v61, %s3129_s10 }
  0x4c   : > { %600 = vrot.lane.b32.xlu0 %v231_v62, %s3129_s10 }
  0x4f   : > { %604 = vrot.lane.b32.xlu1 %v233_v63, %s3129_s10  ;;  %602 = vrot.lane.b32.xlu2 %v232_v0, %s3129_s10 }
  0x54   : > { %606 = vrot.lane.b32.xlu0 %v234_v1, %s3129_s10 }
  0x57   : > { %610 = vrot.lane.b32.xlu1 %v236_v2, %s3129_s10  ;;  %608 = vrot.lane.b32.xlu2 %v235_v3, %s3129_s10 }
  0x5c   : > { %612 = vrot.lane.b32.xlu0 %v237_v4, %s3129_s10 }
  0x5f   : > { %616 = vrot.lane.b32.xlu1 %v239_v5, %s3129_s10  ;;  %614 = vrot.lane.b32.xlu2 %v238_v6, %s3129_s10 }
  0x64   : > { %618 = vrot.lane.b32.xlu0 %v240_v7, %s3129_s10  ;;  %s3134_s10 = smov 112  }
  0x89   : > { %v3371_v11 = vpop.xlane.xlu1 %341 }
  0x8a   : > { %vm404_vm2 = vweird.f32 %v3371_v11 }
  0x8b   : > { %v3364_v9 = vpop.xlane.xlu0 %327 }
  0x8c   : > { %3050 = vrsqrt.f32 %v3364_v9  ;;  %vm384_vm6 = vweird.f32 %v3364_v9 }
  0x91   : > { %v3382_v14 = vpop.xlane.xlu1 %348 }
  0x92   : > { %v3366_v10 = vpop.xlane.xlu2 %355  ;;  %v3490_v53 = vpop.eup %3050  ;;  %vm414_vm12 = vweird.f32 %v3382_v14 }
  0x93   : > { %v3380_v13 = vpop.xlane.xlu0 %334  ;;  %v379_v56 = vmul.f32 %v3490_v53, %v3364_v9  ;;  %vm385_vm5 = vweird.f32 %v3490_v53  ;;  %v458_v9 = vld [vmem:[%s5353_s2] sm:$0xff]  ;;  %vm424_vm15 = vweird.f32 %v3366_v10 }
  0x94   : > { %3052 = vrsqrt.f32 %v3380_v13  ;;  %vm386_vm8 = vmor %vm384_vm6, %vm385_vm5  ;;  %vm394_vm9 = vweird.f32 %v3380_v13 }
  0x95   : > { %3054 = vrsqrt.f32 %v3382_v14  ;;  %v380_v1 = vmul.f32 %v3490_v53, %v379_v56 }
  0x96   : > { %3056 = vrsqrt.f32 %v3371_v11 }
  0x97   : > { %3058 = vrsqrt.f32 %v3366_v10  ;;  %v381_v7 = vmul.f32 0.5, %v380_v1 }
  0x99   : > { %v3387_v17 = vpop.xlane.xlu1 %376 }
  0x9a   : > { %v3378_v12 = vpop.xlane.xlu2 %362  ;;  %v3493_v54 = vpop.eup %3052 }
  0x9b   : > { %v3385_v16 = vpop.xlane.xlu0 %369  ;;  %v389_v62 = vmul.f32 %v3493_v54, %v3380_v13  ;;  %v3532_v4 = vpop.eup %3054  ;;  %3060 = vrsqrt.f32 %v3378_v12  ;;  %vm395_vm7 = vweird.f32 %v3493_v54  ;;  %vm434_vm5 = vweird.f32 %v3378_v12 }
  0x9c   : > { %v409_v8 = vmul.f32 %v3532_v4, %v3382_v14  ;;  %3062 = vrsqrt.f32 %v3385_v16  ;;  %vm396_vm10 = vmor %vm394_vm9, %vm395_vm7  ;;  %vm415_vm11 = vweird.f32 %v3532_v4  ;;  %vm444_vm9 = vweird.f32 %v3385_v16 }
  0x9d   : > { %v390_v5 = vmul.f32 %v3493_v54, %v389_v62  ;;  %3064 = vrsqrt.f32 %v3387_v17  ;;  %vm416_vm13 = vmor %vm414_vm12, %vm415_vm11  ;;  %vm454_vm12 = vweird.f32 %v3387_v17 }
  0xa2   : > { %v591_v15 = vpop.permute.xlu2 %590 }
  0xa3   : > { %655 = vst.msk [vmem:[#allocation2 + $0x10] sm:$0xff] %vm554_vm1, %v591_v15 }
  0xaa   : > { %v597_v18 = vpop.permute.xlu2 %596  ;;  %v3389_v19 = vld [vmem:[#allocation2 + $0x10] sm:$0xff] }
  0xab   : > { %659 = vst.msk [vmem:[#allocation2 + $0x30] sm:$0xff] %vm652_vm3, %v597_v18  ;;  %935 = vrot.lane.b32.xlu0 %v3389_v19, %s3131_s11 }
  0xae   : > { %v589_v20 = vpop.permute.xlu0 %588 }
  0xaf   : > { %v3395_v21 = vsel %vm554_vm1, %v589_v20, %v591_v15  ;;  %653 = vst.msk [vmem:[#allocation2] sm:$0xff] %vm652_vm3, %v589_v20 }
  0xb0   : > { %654 = vst [vmem:[#allocation2 + $0x8] sm:$0xff] %v3395_v21 }
  0xb1   : > { %v593_v23 = vpop.permute.xlu1 %592 }
  0xb2   : > { %656 = vst.msk [vmem:[#allocation2 + $0x18] sm:$0xff] %vm652_vm3, %v593_v23  ;;  %v603_v24 = vpop.permute.xlu2 %602  ;;  %v3488_v52 = vld [vmem:[#allocation2 + $0x30] sm:$0xff] }
  0xb3   : > { %664 = vst.msk [vmem:[#allocation2 + $0x58] sm:$0xff] %vm554_vm1, %v603_v24 }
  0xb6   : > { %v595_v25 = vpop.permute.xlu0 %594  ;;  %v3401_v26 = vld [vmem:[#allocation2] sm:$0xff] }
  0xb7   : > { %v3404_v27 = vsel %vm554_vm1, %v593_v23, %v595_v25  ;;  %658 = vst.msk [vmem:[#allocation2 + $0x28] sm:$0xff] %vm554_vm1, %v595_v25  ;;  %931 = vrot.lane.b32.xlu2 %v3401_v26, %s3131_s11  ;;  %v3458_v43 = vpack.i.bf16 %v3395_v21, %v3401_v26  ;;  %v3552_v23 = vpop.eup %3056 }
  0xb8   : > { %657 = vst [vmem:[#allocation2 + $0x20] sm:$0xff] %v3404_v27  ;;  %vm405_vm14 = vweird.f32 %v3552_v23 }
  0xb9   : > { %v599_v28 = vpop.permute.xlu1 %598  ;;  %v3410_v29 = vld [vmem:[#allocation2 + $0x18] sm:$0xff] }
  0xba   : > { %v3413_v30 = vsel %vm554_vm1, %v597_v18, %v599_v28  ;;  %661 = vst.msk [vmem:[#allocation2 + $0x40] sm:$0xff] %vm554_vm1, %v599_v28  ;;  %v3418_v31 = vpack.i.bf16 %v3410_v29, %v3389_v19  ;;  %v609_v32 = vpop.permute.xlu2 %608  ;;  %v3453_v42 = vld [vmem:[#allocation2 + $0x58] sm:$0xff]  ;;  %v382_v28 = vsub.f32 1.5, %v381_v7 }
  0xbb   : > { %660 = vst [vmem:[#allocation2 + $0x38] sm:$0xff] %v3413_v30  ;;  %v3498_v55 = vpack.i.bf16 %v3413_v30, %v3488_v52 }
  0xbc   : > { %2868 = vrot.lane.b32.xlu1 %v3418_v31, %s3132_s12  ;;  %668 = vst.msk [vmem:[#allocation2 + $0x78] sm:$0xff] %vm652_vm3, %v609_v32  ;;  %v383_v1 = vmul.f32 %v3490_v53, %v382_v28 }
  0xbe   : > { %v601_v33 = vpop.permute.xlu0 %600  ;;  %v3424_v34 = vld [vmem:[#allocation2 + $0x28] sm:$0xff] }
  0xbf   : > { %v3427_v35 = vsel %vm554_vm1, %v601_v33, %v603_v24  ;;  %662 = vst.msk [vmem:[#allocation2 + $0x48] sm:$0xff] %vm652_vm3, %v601_v33  ;;  %937 = vrot.lane.b32.xlu2 %v3410_v29, %s3131_s11  ;;  %v3434_v36 = vpack.i.bf16 %v3424_v34, %v3404_v27  ;;  %v391_v24 = vmul.f32 0.5, %v390_v5 }
  0xc0   : > { %663 = vst [vmem:[#allocation2 + $0x50] sm:$0xff] %v3427_v35  ;;  %v3477_v49 = vpack.i.bf16 %v3453_v42, %v3427_v35 }
  0xc1   : > { %2893 = vrot.lane.b32.xlu0 %v3434_v36, %s3132_s12  ;;  %v605_v37 = vpop.permute.xlu1 %604  ;;  %v3460_v45 = vld [vmem:[#allocation2 + $0x40] sm:$0xff] }
  0xc2   : > { %665 = vst.msk [vmem:[#allocation2 + $0x60] sm:$0xff] %vm652_vm3, %v605_v37  ;;  %v615_v39 = vpop.permute.xlu2 %614 }
  0xc3   : > { %673 = vst.msk [vmem:[#allocation2 + $0xa0] sm:$0xff] %vm554_vm1, %v615_v39  ;;  %v3504_v59 = vld [vmem:[#allocation2 + $0x78] sm:$0xff] }
  0xc6   : > { %v607_v44 = vpop.permute.xlu0 %606  ;;  %v3462_v46 = vld [vmem:[#allocation2 + $0x48] sm:$0xff] }
  0xc7   : > { %v3466_v47 = vsel %vm554_vm1, %v605_v37, %v607_v44  ;;  %667 = vst.msk [vmem:[#allocation2 + $0x70] sm:$0xff] %vm554_vm1, %v607_v44  ;;  %2888 = vrot.lane.b32.xlu2 %v3458_v43, %s3132_s12  ;;  %v3473_v48 = vpack.i.bf16 %v3462_v46, %v3460_v45  ;;  %v399_v44 = vmul.f32 %v3552_v23, %v3371_v11 }
  0xc8   : > { %666 = vst [vmem:[#allocation2 + $0x68] sm:$0xff] %v3466_v47 }
  0xc9   : > { %2873 = vrot.lane.b32.xlu1 %v3473_v48, %s3132_s12  ;;  %2903 = vrot.lane.b32.xlu0 %v3477_v49, %s3132_s12  ;;  %v611_v50 = vpop.permute.xlu1 %610  ;;  %v3530_v3 = vld [vmem:[#allocation2 + $0x60] sm:$0xff]  ;;  %v400_v5 = vmul.f32 %v3552_v23, %v399_v44 }
  0xca   : > { %v3485_v51 = vsel %vm554_vm1, %v609_v32, %v611_v50  ;;  %670 = vst.msk [vmem:[#allocation2 + $0x88] sm:$0xff] %vm554_vm1, %v611_v50  ;;  %v3540_v6 = vpack.i.bf16 %v3466_v47, %v3530_v3  ;;  %v3550_v20 = vld [vmem:[#allocation2 + $0xa0] sm:$0xff]  ;;  %v410_v32 = vmul.f32 %v3532_v4, %v409_v8  ;;  %v392_v50 = vsub.f32 1.5, %v391_v24 }
  0xcb   : > { %669 = vst [vmem:[#allocation2 + $0x80] sm:$0xff] %v3485_v51 }
  0xce   : > { %v613_v57 = vpop.permute.xlu0 %612  ;;  %v3502_v58 = vld [vmem:[#allocation2 + $0x70] sm:$0xff] }
  0xcf   : > { %671 = vst.msk [vmem:[#allocation2 + $0x90] sm:$0xff] %vm652_vm3, %v613_v57  ;;  %2898 = vrot.lane.b32.xlu2 %v3498_v55, %s3132_s12  ;;  %v3511_v60 = vpack.i.bf16 %v3504_v59, %v3502_v58  ;;  %v3514_v61 = vsel %vm554_vm1, %v613_v57, %v615_v39  ;;  %v3565_v39 = vpop.eup %3058  ;;  %v411_v57 = vmul.f32 0.5, %v410_v32  ;;  %v387_v32 = vsel %vm386_vm8, %v3490_v53, %v383_v1  ;;  %v459_v53 = vld [vmem:[%s5353_s2 + $0x8] sm:$0xff] }
  0xd0   : > { %672 = vst [vmem:[#allocation2 + $0x98] sm:$0xff] %v3514_v61  ;;  %v419_v62 = vmul.f32 %v3565_v39, %v3366_v10  ;;  %v3589_v8 = vpop.eup %3060 }
  0xd1   : > { %5392 = vst [vmem:[#allocation5_spill] sm:$0xff] %v3511_v60  ;;  %2878 = vrot.lane.b32.xlu1 %v3511_v60, %s3132_s12  ;;  %v617_v63 = vpop.permute.xlu1 %616  ;;  %v3521_v0 = vld [vmem:[#allocation2 + $0x88] sm:$0xff]  ;;  %v412_v24 = vsub.f32 1.5, %v411_v57  ;;  %v3603_v44 = vpop.eup %3062  ;;  %v429_v13 = vmul.f32 %v3589_v8, %v3378_v12  ;;  %vm435_vm6 = vweird.f32 %v3589_v8 }
  0xd2   : > { %674 = vst.msk [vmem:[#allocation2 + $0xa8] sm:$0xff] %vm652_vm3, %v617_v63  ;;  %v3528_v2 = vpack.i.bf16 %v3521_v0, %v3485_v51  ;;  %v420_v28 = vmul.f32 %v3565_v39, %v419_v62  ;;  %v466_v62 = vmul.f32 %v458_v9, %v387_v32  ;;  %v3065_v60 = vpop.eup %3064  ;;  %v461_v32 = vld [vmem:[%s5353_s2 + $0x18] sm:$0xff]  ;;  %vm406_vm3 = vmor %vm404_vm2, %vm405_vm14  ;;  %vm445_vm8 = vweird.f32 %v3603_v44 }
  0xd3   : > { %v413_v40 = vmul.f32 %v3532_v4, %v412_v24  ;;  %v449_v24 = vmul.f32 %v3065_v60, %v3387_v17  ;;  %vm436_vm7 = vmor %vm434_vm5, %vm435_vm6  ;;  %vm455_vm11 = vweird.f32 %v3065_v60  ;;  %vm828_vm14 = vcmask 1039360  }
  0xd4   : > { %2913 = vrot.lane.b32.xlu0 %v3528_v2, %s3132_s12  ;;  %v421_v1 = vmul.f32 0.5, %v420_v28  ;;  %vm979_vm2 = vcmask 1031168   ;;  %vm1768_vm6 = vcmask 777216  }
  0xd5   : > { %v417_v28 = vsel %vm416_vm13, %v3532_v4, %v413_v40  ;;  %vm456_vm13 = vmor %vm454_vm12, %vm455_vm11  ;;  %vm1913_vm11 = vcmask 769024  }
  0xd6   : > { %v619_v15 = vpop.permute.xlu0 %618  ;;  %v3563_v37 = vld [vmem:[#allocation2 + $0x90] sm:$0xff]  ;;  %v469_v14 = vmul.f32 %v461_v32, %v417_v28 }
  0xd7   : > { %v3545_v18 = vsel %vm554_vm1, %v617_v63, %v619_v15  ;;  %676 = vst.msk [vmem:[#allocation2 + $0xb8] sm:$0xff] %vm554_vm1, %v619_v15  ;;  %2908 = vrot.lane.b32.xlu2 %v3540_v6, %s3132_s12  ;;  %v3574_v56 = vpack.i.bf16 %v3514_v61, %v3563_v37  ;;  %v393_v15 = vmul.f32 %v3493_v54, %v392_v50  ;;  %v401_v50 = vmul.f32 0.5, %v400_v5 }
  0xd8   : > { %675 = vst [vmem:[#allocation2 + $0xb0] sm:$0xff] %v3545_v18  ;;  %v439_v5 = vmul.f32 %v3603_v44, %v3385_v16  ;;  %vm425_vm1 = vweird.f32 %v3565_v39 }
  0xd9   : > { %v3555_v25 = vld [vmem:[#allocation2 + $0xa8] sm:$0xff]  ;;  %5394 = vst [vmem:[#allocation7_spill] sm:$0xff] %v3574_v56  ;;  %v397_v57 = vsel %vm396_vm10, %v3493_v54, %v393_v15  ;;  %v402_v41 = vsub.f32 1.5, %v401_v50  ;;  %v422_v54 = vsub.f32 1.5, %v421_v1  ;;  %vm3633_vm4 = vmor %vm424_vm15, %vm425_vm1  ;;  %vm694_vm15 = vcmp.ge.s32.totalorder %v3442_v38, 1 }
  0xda   : > { %v3561_v33 = vpack.i.bf16 %v3555_v25, %v3550_v20  ;;  %v440_v15 = vmul.f32 %v3603_v44, %v439_v5  ;;  %vm446_vm10 = vmor %vm444_vm9, %vm445_vm8  ;;  %vm1607_vm9 = vcmask 785408  }
  0xdb   : > { %v403_v50 = vmul.f32 %v3552_v23, %v402_v41  ;;  %v423_v4 = vmul.f32 %v3565_v39, %v422_v54 }
  0xdc   : > { %5393 = vst [vmem:[#allocation6_spill] sm:$0xff] %v3561_v33  ;;  %2883 = vrot.lane.b32.xlu1 %v3561_v33, %s3132_s12  ;;  %v430_v33 = vmul.f32 %v3589_v8, %v429_v13  ;;  %v441_v40 = vmul.f32 0.5, %v440_v15  ;;  %v460_v13 = vld [vmem:[%s5353_s2 + $0x10] sm:$0xff] }
  0xdd   : > { %v407_v10 = vsel %vm406_vm3, %v3552_v23, %v403_v50  ;;  %v462_v23 = vld [vmem:[%s5353_s2 + $0x20] sm:$0xff]  ;;  %v465_v50 = vld [vmem:[%s5353_s2 + $0x38] sm:$0xff]  ;;  %vm1140_vm3 = vcmask 916480  }
  0xde   : > { %v3579_v63 = vld [vmem:[#allocation2 + $0xb8] sm:$0xff]  ;;  %v431_v9 = vmul.f32 0.5, %v430_v33  ;;  %v450_v33 = vmul.f32 %v3065_v60, %v449_v24  ;;  %v442_v11 = vsub.f32 1.5, %v441_v40  ;;  %v464_v24 = vld [vmem:[%s5353_s2 + $0x30] sm:$0xff] }
  0xdf   : > { %2918 = vrot.lane.b32.xlu2 %v3574_v56, %s3132_s12  ;;  %v3587_v7 = vpack.i.bf16 %v3579_v63, %v3545_v18  ;;  %v467_v56 = vmul.f32 %v459_v53, %v397_v57  ;;  %v468_v57 = vmul.f32 %v460_v13, %v407_v10  ;;  %v427_v53 = vsel %vm3633_vm4, %v3565_v39, %v423_v4  ;;  %v463_v39 = vld [vmem:[%s5353_s2 + $0x28] sm:$0xff] }
  0xe0   : > { %v432_v41 = vsub.f32 1.5, %v431_v9  ;;  %v470_v12 = vmul.f32 %v462_v23, %v427_v53  ;;  %v443_v5 = vmul.f32 %v3603_v44, %v442_v11  ;;  %vm1301_vm4 = vcmask 908288  }
  0xe1   : > { %2923 = vrot.lane.b32.xlu0 %v3587_v7, %s3132_s12 }
  0xe2   : > { %v433_v1 = vmul.f32 %v3589_v8, %v432_v41  ;;  %v447_v32 = vsel %vm446_vm10, %v3603_v44, %v443_v5 }
  0xe4   : > { %933 = vrot.lane.b32.xlu1 %v3395_v21, %s3131_s11  ;;  %v437_v15 = vsel %vm436_vm7, %v3589_v8, %v433_v1  ;;  %v472_v8 = vmul.f32 %v464_v24, %v447_v32  ;;  %vm1446_vm7 = vcmask 900096  }
  0xe5   : > { %v471_v28 = vmul.f32 %v463_v39, %v437_v15 }
  0xe7   : > { %476 = vperm.xlu2 %2927, %v466_v62   ;;  %v451_v62 = vmul.f32 0.5, %v450_v33 }
  0xe9   : > { %481 = vperm.xlu0 %2928, %v467_v56   ;;  %v452_v54 = vsub.f32 1.5, %v451_v62 }
  0xeb   : > { %v453_v9 = vmul.f32 %v3065_v60, %v452_v54 }
  0xec   : > { %939 = vrot.lane.b32.xlu1 %v3404_v27, %s3131_s11 }
  0xed   : > { %v457_v16 = vsel %vm456_vm13, %v3065_v60, %v453_v9 }
  0xee   : > { %v473_v44 = vmul.f32 %v465_v50, %v457_v16 }
  0xef   : > { %491 = vperm.xlu2 %2927, %v469_v14  }
  0xf1   : > { %941 = vrot.lane.b32.xlu0 %v3424_v34, %s3131_s11 }
  0xf4   : > { %486 = vperm.xlu1 %2929, %v468_v57  }
  0xf7   : > { %496 = vperm.xlu2 %2927, %v470_v12  }
  0xf9   : > { %947 = vrot.lane.b32.xlu0 %v3460_v45, %s3131_s11 }
  0xfc   : > { %501 = vperm.xlu1 %2929, %v471_v28  }
  0xff   : > { %506 = vperm.xlu2 %2927, %v472_v8  }
 0x101   : > { %953 = vrot.lane.b32.xlu0 %v3453_v42, %s3131_s11 }
 0x104   : > { %511 = vperm.xlu1 %2929, %v473_v44  }
 0x107   : > { %943 = vrot.lane.b32.xlu2 %v3488_v52, %s3131_s11 }
 0x109   : > { %959 = vrot.lane.b32.xlu0 %v3502_v58, %s3131_s11 }
 0x10c   : > { %945 = vrot.lane.b32.xlu1 %v3413_v30, %s3131_s11 }
 0x10f   : > { %949 = vrot.lane.b32.xlu2 %v3462_v46, %s3131_s11 }
 0x111   : > { %v3679_v17 = vpop.permute.xlu2 %931  ;;  %965 = vrot.lane.b32.xlu0 %v3521_v0, %s3131_s11 }
 0x114   : > { %951 = vrot.lane.b32.xlu1 %v3427_v35, %s3131_s11 }
 0x117   : > { %955 = vrot.lane.b32.xlu2 %v3530_v3, %s3131_s11 }
 0x119   : > { %v3687_v60 = vpop.permute.xlu2 %937  ;;  %971 = vrot.lane.b32.xlu0 %v3550_v20, %s3131_s11 }
 0x11c   : > { %957 = vrot.lane.b32.xlu1 %v3466_v47, %s3131_s11 }
 0x11d   : > { %v3707_v4 = vpop.permute.xlu0 %935 }
 0x11e   : > { %5397 = vst [vmem:[#allocation8_spill] sm:$0xff] %v3707_v4  ;;  %v5414_v4 = vld [vmem:[#allocation7_spill] sm:$0xff] }
 0x11f   : > { %961 = vrot.lane.b32.xlu2 %v3504_v59, %s3131_s11 }
 0x121   : > { %v3695_v14 = vpop.permute.xlu2 %2888  ;;  %977 = vrot.lane.b32.xlu0 %v3579_v63, %s3131_s11 }
 0x122   : > { %v5363_v33 = vunpack.i.h.bf16 %v3695_v14 }
 0x124   : > { %963 = vrot.lane.b32.xlu1 %v3485_v51, %s3131_s11 }
 0x127   : > { %967 = vrot.lane.b32.xlu2 %v3563_v37, %s3131_s11 }
 0x129   : > { %v3703_v40 = vpop.permute.xlu2 %2898  ;;  %1096 = vrot.lane.b32.xlu0 %v3389_v19, %s3134_s10 }
 0x12a   : > { %v5365_v1 = vunpack.i.h.bf16 %v3703_v40 }
 0x12c   : > { %969 = vrot.lane.b32.xlu1 %v3514_v61, %s3131_s11 }
 0x12e   : > { %v3711_v56 = vpop.permute.xlu1 %2868 }
 0x12f   : > { %973 = vrot.lane.b32.xlu2 %v3555_v25, %s3131_s11  ;;  %v2870_v41 = vunpack.i.l.bf16 %v3711_v56 }
 0x131   : > { %v3717_v10 = vpop.permute.xlu2 %2908  ;;  %1102 = vrot.lane.b32.xlu0 %v3424_v34, %s3134_s10  ;;  %v3724_v19 = vsel %vm828_vm14, %v5363_v33, %v2870_v41 }
 0x132   : > { %v2911_v32 = vunpack.i.h.bf16 %v3717_v10 }
 0x133   : > { %v3726_v13 = vpop.permute.xlu0 %2893 }
 0x134   : > { %v2896_v11 = vunpack.i.h.bf16 %v3726_v13  ;;  %v5364_v57 = vunpack.i.l.bf16 %v3726_v13  ;;  %975 = vrot.lane.b32.xlu1 %v3545_v18, %s3131_s11  ;;  %s3135_s11 = smov 111  }
 0x136   : > { %v3735_v53 = vsel %vm828_vm14, %v5364_v57, %v2896_v11 }
 0x137   : > { %1092 = vrot.lane.b32.xlu2 %v3401_v26, %s3134_s10 }
 0x139   : > { %v2919_v34 = vpop.permute.xlu2 %2918  ;;  %1108 = vrot.lane.b32.xlu0 %v3460_v45, %s3134_s10 }
 0x13a   : > { %v2921_v44 = vunpack.i.h.bf16 %v2919_v34 }
 0x13b   : > { %v3741_v23 = vpop.permute.xlu1 %2873  ;;  %v3743_v62 = vpop.permute.xlu0 %2903 }
 0x13c   : > { %v2875_v12 = vunpack.i.l.bf16 %v3741_v23  ;;  %v2906_v5 = vunpack.i.h.bf16 %v3743_v62  ;;  %v2905_v54 = vunpack.i.l.bf16 %v3743_v62  ;;  %1094 = vrot.lane.b32.xlu1 %v3395_v21, %s3134_s10 }
 0x13e   : > { %v3752_v15 = vsel %vm828_vm14, %v2905_v54, %v2906_v5  ;;  %v3757_v45 = vsel %vm828_vm14, %v5365_v1, %v2875_v12  ;;  %v2920_v12 = vunpack.i.l.bf16 %v2919_v34 }
 0x13f   : > { %1098 = vrot.lane.b32.xlu2 %v3410_v29, %s3134_s10 }
 0x140   : > { %v841_v34 = vsel %vm828_vm14, %v2920_v12, %v2921_v44  ;;  %v2890_v12 = vunpack.i.l.bf16 %v3695_v14 }
 0x141   : > { %v3761_v39 = vpop.permute.xlu2 %476  ;;  %1114 = vrot.lane.b32.xlu0 %v3453_v42, %s3134_s10 }
 0x143   : > { %v2879_v28 = vpop.permute.xlu1 %2878 }
 0x144   : > { %v2880_v21 = vunpack.i.l.bf16 %v2879_v28  ;;  %1100 = vrot.lane.b32.xlu1 %v3404_v27, %s3134_s10 }
 0x146   : > { %v2914_v24 = vpop.permute.xlu0 %2913  ;;  %v3769_v9 = vsel %vm828_vm14, %v2911_v32, %v2880_v21 }
 0x147   : > { %1104 = vrot.lane.b32.xlu2 %v3488_v52, %s3134_s10  ;;  %v2916_v8 = vunpack.i.h.bf16 %v2914_v24  ;;  %v2915_v16 = vunpack.i.l.bf16 %v2914_v24 }
 0x149   : > { %v3773_v50 = vpop.permute.xlu2 %491  ;;  %1120 = vrot.lane.b32.xlu0 %v3502_v58, %s3134_s10  ;;  %v3778_v42 = vsel %vm828_vm14, %v2915_v16, %v2916_v8  ;;  %v2881_v8 = vunpack.i.h.bf16 %v2879_v28  ;;  %v2876_v28 = vunpack.i.h.bf16 %v3741_v23 }
 0x14b   : > { %v835_v23 = vsel %vm828_vm14, %v2876_v28, %v2905_v54  ;;  %v5400_v54 = vunpack.i.l.bf16 %v3726_v13 }
 0x14c   : > { %1106 = vrot.lane.b32.xlu1 %v3413_v30, %s3134_s10 }
 0x14e   : > { %v2884_v27 = vpop.permute.xlu1 %2883 }
 0x14f   : > { %1110 = vrot.lane.b32.xlu2 %v3462_v46, %s3134_s10  ;;  %v2885_v41 = vunpack.i.l.bf16 %v2884_v27  ;;  %v2886_v5 = vunpack.i.h.bf16 %v2884_v27 }
 0x151   : > { %v3784_v11 = vpop.permute.xlu2 %496  ;;  %1126 = vrot.lane.b32.xlu0 %v3521_v0, %s3134_s10  ;;  %v3789_v62 = vsel %vm828_vm14, %v2921_v44, %v2885_v41  ;;  %v2910_v0 = vunpack.i.l.bf16 %v3717_v10  ;;  %v839_v41 = vsel %vm828_vm14, %v2881_v8, %v2915_v16  ;;  %v2900_v10 = vunpack.i.l.bf16 %v3703_v40 }
 0x153   : > { %v2924_v58 = vpop.permute.xlu0 %2923 }
 0x154   : > { %v2926_v21 = vunpack.i.h.bf16 %v2924_v58  ;;  %v2925_v24 = vunpack.i.l.bf16 %v2924_v58  ;;  %1112 = vrot.lane.b32.xlu1 %v3427_v35, %s3134_s10 }
 0x156   : > { %v3793_v33 = vpop.permute.xlu1 %933  ;;  %v843_v57 = vsel %vm828_vm14, %v2886_v5, %v2925_v24  ;;  %v3797_v1 = vsel %vm828_vm14, %v2925_v24, %v2926_v21  ;;  %v2871_v5 = vunpack.i.h.bf16 %v3711_v56  ;;  %v3088_v56 = vld [vmem:[%s5352_s1 + $0x100] sm:$0xff] }
 0x157   : > { %1116 = vrot.lane.b32.xlu2 %v3530_v3, %s3134_s10  ;;  %2194 = vmatpush.msra.mxu0 %v843_v57 }
 0x158   : > { %2816 = vmatpush.msra.mxu2 %v843_v57  ;;  %v837_v57 = vsel %vm828_vm14, %v2910_v0, %v2911_v32  ;;  %v5399_v32 = vunpack.i.h.bf16 %v3703_v40  ;;  %v831_v8 = vsel %vm828_vm14, %v2871_v5, %v5400_v54  ;;  %v5404_v40 = vunpack.i.h.bf16 %v3695_v14  ;;  %v3068_v5 = vld [vmem:[%s5352_s1 + $0x28] sm:$0xff] }
 0x159   : > { %v3803_v27 = vpop.permute.xlu2 %506  ;;  %1132 = vrot.lane.b32.xlu0 %v3550_v20, %s3134_s10  ;;  %2195 = vmatpush.msra.mxu0 %v841_v34  ;;  %v5398_v20 = vmov 0  }
 0x15a   : > { %2817 = vmatpush.msra.mxu2 %v841_v34  ;;  %v3817_v44 = vsel %vm694_vm15, 1, %v5398_v20  ;;  %v833_v21 = vsel %vm828_vm14, %v2900_v10, %v5399_v32 }
 0x15b   : > { %v3810_v58 = vpop.permute.xlu0 %481  ;;  %2196 = vmatpush.msra.mxu0 %v839_v41  ;;  %v696_v16 = vperm.slane %v3817_v44, 0 }
 0x15c   : > { %2818 = vmatpush.msra.mxu2 %v839_v41  ;;  %1118 = vrot.lane.b32.xlu1 %v3466_v47, %s3134_s10  ;;  %v3938_v32 = vmul.f32 %v3068_v5, %v3810_v58 }
 0x15d   : > { %2197 = vmatpush.msra.mxu0 %v837_v57  ;;  %vm3839_vm1 = vcmp.eq.s32.totalorder %v696_v16, 1 }
 0x15e   : > { %2819 = vmatpush.msra.mxu2 %v837_v57  ;;  %v3819_v38 = vpop.permute.xlu1 %939  ;;  %v3067_v57 = vld [vmem:[%s5352_s1 + $0xa0] sm:$0xff] }
 0x15f   : > { %1122 = vrot.lane.b32.xlu2 %v3504_v59, %s3134_s10  ;;  %2198 = vmatpush.msra.mxu0 %v835_v23  ;;  %v3919_v20 = vmul.f32 %v3067_v57, %v3784_v11 }
 0x160   : > { %2820 = vmatpush.msra.mxu2 %v835_v23 }
 0x161   : > { %v3830_v24 = vpop.permute.xlu2 %943  ;;  %1138 = vrot.lane.b32.xlu0 %v3579_v63, %s3134_s10  ;;  %2199 = vmatpush.msra.mxu0 %v833_v21  ;;  %v829_v63 = vsel %vm828_vm14, %v2890_v12, %v5404_v40  ;;  %5405 = vst [vmem:[#allocation10_spill] sm:$0xff] %v3919_v20  ;;  %v3069_v40 = vld [vmem:[%s5352_s1 + $0x50] sm:$0xff] }
 0x162   : > { %2821 = vmatpush.msra.mxu2 %v833_v21 }
 0x163   : > { %v3837_v0 = vpop.permute.xlu0 %941  ;;  %2200 = vmatpush.msra.mxu0 %v831_v8 }
 0x164   : > { %5401 = vst [vmem:[#allocation9_spill] sm:$0xff] %v3837_v0  ;;  %2822 = vmatpush.msra.mxu2 %v831_v8  ;;  %1124 = vrot.lane.b32.xlu1 %v3485_v51, %s3134_s10 }
 0x165   : > { %2201 = vmatpush.msra.mxu0 %v829_v63 }
 0x166   : > { %2823 = vmatpush.msra.mxu2 %v829_v63  ;;  %v3848_v13 = vpop.permute.xlu1 %486 }
 0x167   : > { %1128 = vrot.lane.b32.xlu2 %v3563_v37, %s3134_s10  ;;  %2720 = vmatpush.msk.msra.mxu0 %vm3839_vm1, %v3555_v25  ;;  %v3963_v63 = vmul.f32 %v3069_v40, %v3848_v13  ;;  %v3071_v40 = vld [vmem:[%s5352_s1 + $0x78] sm:$0xff] }
 0x168   : > { %2824 = vmatpush.msk.msra.mxu2 %vm3839_vm1, %v3555_v25 }
 0x169   : > { %v950_v34 = vpop.permute.xlu2 %949  ;;  %2941 = vrot.lane.b32.xlu0 %v3434_v36, %s3135_s11  ;;  %2721 = vmatpush.msk.msra.mxu0 %vm3839_vm1, %v3563_v37  ;;  %5408 = vst [vmem:[#allocation13_spill] sm:$0xff] %v3963_v63 }
 0x16a   : > { %2825 = vmatpush.msk.msra.mxu2 %vm3839_vm1, %v3563_v37 }
 0x16b   : > { %v948_v14 = vpop.permute.xlu0 %947  ;;  %2722 = vmatpush.msk.msra.mxu0 %vm3839_vm1, %v3504_v59 }
 0x16c   : > { %2826 = vmatpush.msk.msra.mxu2 %vm3839_vm1, %v3504_v59  ;;  %1130 = vrot.lane.b32.xlu1 %v3514_v61, %s3134_s10 }
 0x16d   : > { %2723 = vmatpush.msk.msra.mxu0 %vm3839_vm1, %v3530_v3 }
 0x16e   : > { %2827 = vmatpush.msk.msra.mxu2 %vm3839_vm1, %v3530_v3  ;;  %v3880_v36 = vpop.permute.xlu1 %501 }
 0x16f   : > { %1134 = vrot.lane.b32.xlu2 %v3555_v25, %s3134_s10  ;;  %2724 = vmatpush.msk.msra.mxu0 %vm3839_vm1, %v3462_v46  ;;  %v3942_v21 = vmul.f32 %v3880_v36, %v3287_v22 }
 0x170   : > { %2828 = vmatpush.msk.msra.mxu2 %vm3839_vm1, %v3462_v46 }
 0x171   : > { %v956_v28 = vpop.permute.xlu2 %955  ;;  %2956 = vrot.lane.b32.xlu0 %v3477_v49, %s3135_s11  ;;  %2725 = vmatpush.msk.msra.mxu0 %vm3839_vm1, %v3488_v52  ;;  %v3066_v49 = vld [vmem:[%s5352_s1] sm:$0xff]  ;;  %5406 = vst [vmem:[#allocation11_spill] sm:$0xff] %v3942_v21 }
 0x172   : > { %2829 = vmatpush.msk.msra.mxu2 %vm3839_vm1, %v3488_v52  ;;  %v3910_v10 = vmul.f32 %v3066_v49, %v3761_v39 }
 0x173   : > { %v954_v41 = vpop.permute.xlu0 %953  ;;  %2726 = vmatpush.msk.msra.mxu0 %vm3839_vm1, %v3410_v29 }
 0x174   : > { %2830 = vmatpush.msk.msra.mxu2 %vm3839_vm1, %v3410_v29  ;;  %1136 = vrot.lane.b32.xlu1 %v3545_v18, %s3134_s10 }
 0x175   : > { %2727 = vmatpush.msk.msra.mxu0 %vm3839_vm1, %v3401_v26 }
 0x176   : > { %2831 = vmatpush.msk.msra.mxu2 %vm3839_vm1, %v3401_v26  ;;  %2210 = vmatmul.f32.vlgmr.msra.gmra.mxu0 %v3910_v10  ;;  %v3925_v23 = vpop.permute.xlu1 %511 }
 0x177   : > { %2931 = vrot.lane.b32.xlu2 %v3458_v43, %s3135_s11  ;;  %2222 = vmatmul.f32.vlgmr.msra.gmra.mxu2 %v3919_v20 }
 0x179   : > { %v962_v16 = vpop.permute.xlu2 %961  ;;  %2971 = vrot.lane.b32.xlu0 %v3528_v2, %s3135_s11 }
 0x17b   : > { %v960_v12 = vpop.permute.xlu0 %959 }
 0x17c   : > { %2936 = vrot.lane.b32.xlu1 %v3418_v31, %s3135_s11 }
 0x17e   : > { %2213 = vmatmul.f32.gmra.mxu0 %v3938_v32  ;;  %v946_v54 = vpop.permute.xlu1 %945 }
 0x17f   : > { %2946 = vrot.lane.b32.xlu2 %v3498_v55, %s3135_s11  ;;  %2225 = vmatmul.f32.gmra.mxu2 %v3942_v21  ;;  %v3949_v31 = vsel %vm979_vm2, %v946_v54, %v948_v14  ;;  %v3953_v2 = vsel %vm979_vm2, %v3830_v24, %v946_v54  ;;  %v3070_v24 = vld [vmem:[%s5352_s1 + $0xf0] sm:$0xff]  ;;  %v5411_v54 = vld [vmem:[#allocation5_spill] sm:$0xff] }
 0x180   : > { %5407 = vst [vmem:[#allocation12_spill] sm:$0xff] %v3949_v31  ;;  %v3969_v14 = vmul.f32 %v3070_v24, %v3803_v27  ;;  %v3989_v24 = vmul.f32 %v3071_v40, %v3773_v50  ;;  %v2990_v40 = vpack.i.bf16 %v3545_v18, %v3555_v25 }
 0x181   : > { %v968_v8 = vpop.permute.xlu2 %967  ;;  %2986 = vrot.lane.b32.xlu0 %v3587_v7, %s3135_s11 }
 0x182   : > { %5409 = vst [vmem:[#allocation14_spill] sm:$0xff] %v3969_v14 }
 0x183   : > { %v966_v22 = vpop.permute.xlu0 %965  ;;  %5412 = vst [vmem:[#allocation5_spill] sm:$0xff] %v3989_v24 }
 0x184   : > { %2951 = vrot.lane.b32.xlu1 %v3473_v48, %s3135_s11 }
 0x186   : > { %2216 = vmatmul.f32.gmra.mxu0 %v3963_v63  ;;  %v952_v7 = vpop.permute.xlu1 %951 }
 0x187   : > { %2961 = vrot.lane.b32.xlu2 %v3540_v6, %s3135_s11  ;;  %2228 = vmatmul.f32.gmra.mxu2 %v3969_v14  ;;  %v3976_v48 = vsel %vm979_vm2, %v952_v7, %v954_v41  ;;  %v3979_v49 = vsel %vm979_vm2, %v950_v34, %v952_v7  ;;  %v3072_v34 = vld [vmem:[%s5352_s1 + $0x118] sm:$0xff] }
 0x188   : > { %5410 = vst [vmem:[#allocation15_spill] sm:$0xff] %v3976_v48  ;;  %v3995_v41 = vmul.f32 %v3072_v34, %v3925_v23  ;;  %v5416_v48 = vld [vmem:[#allocation6_spill] sm:$0xff] }
 0x189   : > { %v974_v57 = vpop.permute.xlu2 %973  ;;  %1442 = vrot.lane.b32.xlu0 %v3545_v18, %s3136_s24 }
 0x18a   : > { %5413 = vst [vmem:[#allocation16_spill] sm:$0xff] %v3995_v41 }
 0x18b   : > { %v972_v5 = vpop.permute.xlu0 %971 }
 0x18c   : > { %2966 = vrot.lane.b32.xlu1 %v5411_v54, %s3135_s11 }
 0x18e   : > { %2219 = vmatmul.f32.gmra.mxu0 %v3989_v24  ;;  %v958_v7 = vpop.permute.xlu1 %957 }
 0x18f   : > { %2976 = vrot.lane.b32.xlu2 %v5414_v4, %s3135_s11  ;;  %2231 = vmatmul.f32.gmra.mxu2 %v3995_v41  ;;  %v4002_v54 = vsel %vm979_vm2, %v958_v7, %v960_v12  ;;  %v4007_v0 = vsel %vm979_vm2, %v956_v28, %v958_v7  ;;  %v4121_v41 = vld [vmem:[#allocation2 + $0x18] sm:$0xff] }
 0x190   : > { %5415 = vst [vmem:[#allocation7_spill] sm:$0xff] %v4002_v54 }
 0x191   : > { %v1093_v31 = vpop.permute.xlu2 %1092  ;;  %2991 = vrot.lane.b32.xlu0 %v2990_v40, %s3137_s29 }
 0x193   : > { %v978_v34 = vpop.permute.xlu0 %977 }
 0x194   : > { %2981 = vrot.lane.b32.xlu1 %v5416_v48, %s3135_s11 }
 0x196   : > { %v964_v14 = vpop.permute.xlu1 %963 }
 0x197   : > { %1398 = vrot.lane.b32.xlu2 %v3401_v26, %s3136_s24  ;;  %v4015_v12 = vsel %vm979_vm2, %v964_v14, %v966_v22  ;;  %v4018_v54 = vsel %vm979_vm2, %v962_v16, %v964_v14  ;;  %v3000_v16 = vpack.i.bf16 %v3485_v51, %v3504_v59 }
 0x198   : > { %5417 = vst [vmem:[#allocation6_spill] sm:$0xff] %v4015_v12 }
 0x199   : > { %v4020_v28 = vpop.permute.xlu2 %1098  ;;  %2996 = vrot.lane.b32.xlu0 %v5414_v4, %s3137_s29 }
 0x19b   : > { %v1097_v7 = vpop.permute.xlu0 %1096 }
 0x19c   : > { %1440 = vrot.lane.b32.xlu1 %v3555_v25, %s3136_s24 }
 0x19e   : > { %v970_v48 = vpop.permute.xlu1 %969 }
 0x19f   : > { %1434 = vrot.lane.b32.xlu2 %v3563_v37, %s3136_s24  ;;  %v4029_v26 = vsel %vm979_vm2, %v970_v48, %v972_v5  ;;  %v4034_v22 = vsel %vm979_vm2, %v968_v8, %v970_v48 }
 0x1a0   : > { %5418 = vst [vmem:[#allocation17_spill] sm:$0xff] %v4029_v26 }
 0x1a1   : > { %v4036_v14 = vpop.permute.xlu2 %1104  ;;  %3001 = vrot.lane.b32.xlu0 %v3000_v16, %s3137_s29 }
 0x1a3   : > { %v1103_v4 = vpop.permute.xlu0 %1102 }
 0x1a4   : > { %1436 = vrot.lane.b32.xlu1 %v3514_v61, %s3136_s24 }
 0x1a6   : > { %v976_v40 = vpop.permute.xlu1 %975 }
 0x1a7   : > { %1428 = vrot.lane.b32.xlu2 %v3504_v59, %s3136_s24  ;;  %v4044_v5 = vsel %vm979_vm2, %v976_v40, %v978_v34  ;;  %v4047_v12 = vsel %vm979_vm2, %v974_v57, %v976_v40  ;;  %v3010_v57 = vpack.i.bf16 %v3427_v35, %v3462_v46 }
 0x1a8   : > { %5419 = vst [vmem:[#allocation18_spill] sm:$0xff] %v4044_v5 }
 0x1a9   : > { %v4049_v8 = vpop.permute.xlu2 %1110  ;;  %3006 = vrot.lane.b32.xlu0 %v3540_v6, %s3137_s29 }
 0x1ab   : > { %v1109_v48 = vpop.permute.xlu0 %1108 }
 0x1ac   : > { %1430 = vrot.lane.b32.xlu1 %v3485_v51, %s3136_s24 }
 0x1ae   : > { %v1095_v16 = vpop.permute.xlu1 %1094 }
 0x1af   : > { %1422 = vrot.lane.b32.xlu2 %v3530_v3, %s3136_s24  ;;  %v4058_v34 = vsel %vm1140_vm3, %v1095_v16, %v1097_v7  ;;  %v4063_v40 = vsel %vm1140_vm3, %v1093_v31, %v1095_v16 }
 0x1b0   : > { %5420 = vst [vmem:[#allocation19_spill] sm:$0xff] %v4058_v34 }
 0x1b1   : > { %v4065_v26 = vpop.permute.xlu2 %1116  ;;  %3011 = vrot.lane.b32.xlu0 %v3010_v57, %s3137_s29 }
 0x1b3   : > { %v1115_v6 = vpop.permute.xlu0 %1114 }
 0x1b4   : > { %1424 = vrot.lane.b32.xlu1 %v3466_v47, %s3136_s24 }
 0x1b6   : > { %v4070_v5 = vpop.permute.xlu1 %1100 }
 0x1b7   : > { %1416 = vrot.lane.b32.xlu2 %v3462_v46, %s3136_s24  ;;  %v4076_v7 = vsel %vm1140_vm3, %v4070_v5, %v1103_v4 }
 0x1b8   : > { %5421 = vst [vmem:[#allocation20_spill] sm:$0xff] %v4076_v7 }
 0x1b9   : > { %v4078_v34 = vpop.permute.xlu2 %1122  ;;  %3016 = vrot.lane.b32.xlu0 %v3498_v55, %s3137_s29 }
 0x1bb   : > { %v1121_v31 = vpop.permute.xlu0 %1120 }
 0x1bc   : > { %1418 = vrot.lane.b32.xlu1 %v3427_v35, %s3136_s24 }
 0x1be   : > { %v4084_v16 = vpop.permute.xlu1 %1106 }
 0x1bf   : > { %1410 = vrot.lane.b32.xlu2 %v3488_v52, %s3136_s24  ;;  %v4090_v47 = vsel %vm1140_vm3, %v4084_v16, %v1109_v48 }
 0x1c0   : > { %5422 = vst [vmem:[#allocation21_spill] sm:$0xff] %v4090_v47 }
 0x1c1   : > { %v1129_v4 = vpop.permute.xlu2 %1128  ;;  %3026 = vrot.lane.b32.xlu0 %v3458_v43, %s3137_s29  ;;  %v4106_v43 = vld [vmem:[#allocation2 + $0x20] sm:$0xff] }
 0x1c2   : > { %v3020_v47 = vpack.i.bf16 %v4106_v43, %v4121_v41 }
 0x1c3   : > { %v1127_v57 = vpop.permute.xlu0 %1126 }
 0x1c4   : > { %1412 = vrot.lane.b32.xlu1 %v3413_v30, %s3136_s24  ;;  %v4110_v30 = vld [vmem:[#allocation2 + $0x8] sm:$0xff] }
 0x1c6   : > { %v4096_v55 = vpop.permute.xlu1 %1112 }
 0x1c7   : > { %1404 = vrot.lane.b32.xlu2 %v3410_v29, %s3136_s24  ;;  %v4102_v35 = vsel %vm1140_vm3, %v4096_v55, %v1115_v6 }
 0x1c8   : > { %5423 = vst [vmem:[#allocation22_spill] sm:$0xff] %v4102_v35 }
 0x1c9   : > { %v1135_v52 = vpop.permute.xlu2 %1134  ;;  %1595 = vrot.lane.b32.xlu0 %v3563_v37, %s3138_s30 }
 0x1cb   : > { %v1133_v48 = vpop.permute.xlu0 %1132 }
 0x1cc   : > { %1406 = vrot.lane.b32.xlu1 %v4106_v43, %s3136_s24 }
 0x1ce   : > { %v1119_v7 = vpop.permute.xlu1 %1118 }
 0x1cf   : > { %1400 = vrot.lane.b32.xlu2 %v4110_v30, %s3136_s24  ;;  %v4115_v29 = vsel %vm1140_vm3, %v1119_v7, %v1121_v31 }
 0x1d0   : > { %5424 = vst [vmem:[#allocation23_spill] sm:$0xff] %v4115_v29 }
 0x1d1   : > { %v4117_v6 = vpop.permute.xlu2 %2931  ;;  %1591 = vrot.lane.b32.xlu0 %v3485_v51, %s3138_s30 }
 0x1d3   : > { %v1139_v35 = vpop.permute.xlu0 %1138 }
 0x1d4   : > { %3021 = vrot.lane.b32.xlu1 %v3020_v47, %s3137_s29 }
 0x1d6   : > { %v1125_v21 = vpop.permute.xlu1 %1124 }
 0x1d7   : > { %1601 = vrot.lane.b32.xlu2 %v3555_v25, %s3138_s30  ;;  %v4129_v31 = vsel %vm1140_vm3, %v1125_v21, %v1127_v57 }
 0x1d8   : > { %5425 = vst [vmem:[#allocation24_spill] sm:$0xff] %v4129_v31 }
 0x1d9   : > { %v4131_v29 = vpop.permute.xlu2 %2946  ;;  %1577 = vrot.lane.b32.xlu0 %v3462_v46, %s3138_s30 }
 0x1db   : > { %v2942_v51 = vpop.permute.xlu0 %2941 }
 0x1dc   : > { %v2944_v20 = vunpack.i.h.bf16 %v2942_v51  ;;  %v2943_v24 = vunpack.i.l.bf16 %v2942_v51  ;;  %1603 = vrot.lane.b32.xlu1 %v3545_v18, %s3138_s30 }
 0x1de   : > { %v1131_v47 = vpop.permute.xlu1 %1130  ;;  %v4138_v63 = vsel %vm1301_vm4, %v2943_v24, %v2944_v20 }
 0x1df   : > { %5426 = vst [vmem:[#allocation25_spill] sm:$0xff] %v4138_v63  ;;  %1597 = vrot.lane.b32.xlu2 %v3514_v61, %s3138_s30  ;;  %v4143_v25 = vsel %vm1140_vm3, %v1131_v47, %v1133_v48 }
 0x1e1   : > { %v4145_v57 = vpop.permute.xlu2 %2961  ;;  %1909 = vrot.lane.b32.xlu0 %v3545_v18, %s3139_s7 }
 0x1e3   : > { %v4149_v46 = vpop.permute.xlu0 %2956 }
 0x1e4   : > { %v2959_v51 = vunpack.i.h.bf16 %v4149_v46  ;;  %v2958_v31 = vunpack.i.l.bf16 %v4149_v46  ;;  %1589 = vrot.lane.b32.xlu1 %v3504_v59, %s3138_s30  ;;  %v5376_v46 = vunpack.i.h.bf16 %v4145_v57 }
 0x1e6   : > { %v1137_v20 = vpop.permute.xlu1 %1136  ;;  %v4158_v61 = vsel %vm1301_vm4, %v2958_v31, %v2959_v51  ;;  %v1153_v51 = vsel %vm1140_vm3, %v1129_v4, %v1131_v47  ;;  %v4195_v4 = vld [vmem:[#allocation2 + $0x50] sm:$0xff]  ;;  %v5373_v47 = vunpack.i.h.bf16 %v4117_v6 }
 0x1e7   : > { %5427 = vst [vmem:[#allocation26_spill] sm:$0xff] %v4158_v61  ;;  %1583 = vrot.lane.b32.xlu2 %v3530_v3, %s3138_s30  ;;  %v4163_v18 = vsel %vm1140_vm3, %v1137_v20, %v1139_v35  ;;  %v1155_v48 = vsel %vm1140_vm3, %v1135_v52, %v1137_v20  ;;  %v4181_v35 = vld [vmem:[#allocation2 + $0x68] sm:$0xff]  ;;  %v1151_v52 = vsel %vm1140_vm3, %v4078_v34, %v1125_v21 }
 0x1e8   : > { %2728 = vmatpush.msk.msra.mxu1 %vm3839_vm1, %v1155_v48  ;;  %2832 = vmatpush.msk.msra.mxu3 %vm3839_vm1, %v1155_v48 }
 0x1e9   : > { %v4170_v59 = vpop.permute.xlu2 %2976  ;;  %1901 = vrot.lane.b32.xlu0 %v3563_v37, %s3139_s7  ;;  %v1149_v37 = vsel %vm1140_vm3, %v4065_v26, %v1119_v7 }
 0x1ea   : > { %2729 = vmatpush.msk.msra.mxu1 %vm3839_vm1, %v1153_v51  ;;  %2833 = vmatpush.msk.msra.mxu3 %vm3839_vm1, %v1153_v51  ;;  %v1147_v51 = vsel %vm1140_vm3, %v4049_v8, %v4096_v55 }
 0x1eb   : > { %v4179_v3 = vpop.permute.xlu0 %2971 }
 0x1ec   : > { %v2974_v20 = vunpack.i.h.bf16 %v4179_v3  ;;  %v5372_v48 = vunpack.i.l.bf16 %v4179_v3  ;;  %1585 = vrot.lane.b32.xlu1 %v4181_v35, %s3138_s30  ;;  %2730 = vmatpush.msk.msra.mxu1 %vm3839_vm1, %v1151_v52 }
 0x1ed   : > { %2834 = vmatpush.msk.msra.mxu3 %vm3839_vm1, %v1151_v52  ;;  %v5429_v52 = vld [vmem:[#allocation4_spill] sm:$0xff] }
 0x1ee   : > { %2731 = vmatpush.msk.msra.mxu1 %vm3839_vm1, %v1149_v37  ;;  %v2937_v21 = vpop.permute.xlu1 %2936  ;;  %v4202_v34 = vsel %vm1301_vm4, %v5372_v48, %v2974_v20  ;;  %v903_v20 = vperm.slane %v5429_v52, 0 }
 0x1ef   : > { %5428 = vst [vmem:[#allocation27_spill] sm:$0xff] %v4202_v34  ;;  %1579 = vrot.lane.b32.xlu2 %v4195_v4, %s3138_s30  ;;  %2835 = vmatpush.msk.msra.mxu3 %vm3839_vm1, %v1149_v37  ;;  %v2939_v26 = vunpack.i.h.bf16 %v2937_v21  ;;  %v2938_v7 = vunpack.i.l.bf16 %v2937_v21  ;;  %v1145_v37 = vsel %vm1140_vm3, %v4036_v14, %v4084_v16  ;;  %v1143_v14 = vsel %vm1140_vm3, %v4020_v28, %v4070_v5 }
 0x1f0   : > { %2732 = vmatpush.msk.msra.mxu1 %vm3839_vm1, %v1147_v51  ;;  %vm4246_vm5 = vcmp.eq.s32.totalorder %v903_v20, 1  ;;  %v5374_v20 = vunpack.i.h.bf16 %v4131_v29  ;;  %v5450_v34 = vunpack.i.h.bf16 %v4170_v59 }
 0x1f1   : > { %v4215_v48 = vpop.permute.xlu2 %1398  ;;  %2836 = vmatpush.msk.msra.mxu3 %vm3839_vm1, %v1147_v51  ;;  %1567 = vrot.lane.b32.xlu0 %v4106_v43, %s3138_s30  ;;  %v4225_v21 = vsel %vm1301_vm4, %v2939_v26, %v2943_v24  ;;  %v4230_v8 = vsel %vm1301_vm4, %v5373_v47, %v2938_v7  ;;  %v1838_v51 = vld [vmem:[#allocation2 + $0xa8] sm:$0xff]  ;;  %v4252_v7 = vld [vmem:[#allocation2 + $0x30] sm:$0xff] }
 0x1f2   : > { %5430 = vst [vmem:[#allocation4_spill] sm:$0xff] %v4230_v8  ;;  %2733 = vmatpush.msk.msra.mxu1 %vm3839_vm1, %v1145_v37 }
 0x1f3   : > { %2837 = vmatpush.msk.msra.mxu3 %vm3839_vm1, %v1145_v37  ;;  %v4236_v55 = vpop.permute.xlu0 %2986 }
 0x1f4   : > { %v2989_v24 = vunpack.i.h.bf16 %v4236_v55  ;;  %v5375_v16 = vunpack.i.l.bf16 %v4236_v55  ;;  %1907 = vrot.lane.b32.xlu1 %v1838_v51, %s3139_s7  ;;  %2734 = vmatpush.msk.msra.mxu1 %vm3839_vm1, %v1143_v14 }
 0x1f5   : > { %2838 = vmatpush.msk.msra.mxu3 %vm3839_vm1, %v1143_v14  ;;  %v4271_v14 = vld [vmem:[#allocation2] sm:$0xff] }
 0x1f6   : > { %2735 = vmatpush.msk.msra.mxu1 %vm3839_vm1, %v4063_v40  ;;  %v2952_v28 = vpop.permute.xlu1 %2951  ;;  %v4260_v5 = vsel %vm1301_vm4, %v5375_v16, %v2989_v24 }
 0x1f7   : > { %1571 = vrot.lane.b32.xlu2 %v4252_v7, %s3138_s30  ;;  %2839 = vmatpush.msk.msra.mxu3 %vm3839_vm1, %v4063_v40  ;;  %v2954_v37 = vunpack.i.h.bf16 %v2952_v28  ;;  %v2953_v51 = vunpack.i.l.bf16 %v2952_v28  ;;  %v4298_v28 = vld [vmem:[#allocation2 + $0x38] sm:$0xff] }
 0x1f8   : > { %2736 = vmatpush.msk.msra.mxu1 %vm4246_vm5, %v4047_v12 }
 0x1f9   : > { %v4273_v47 = vpop.permute.xlu2 %1434  ;;  %2840 = vmatpush.msk.msra.mxu3 %vm4246_vm5, %v4047_v12  ;;  %1559 = vrot.lane.b32.xlu0 %v4271_v14, %s3138_s30  ;;  %v4283_v40 = vsel %vm1301_vm4, %v2954_v37, %v2958_v31  ;;  %v4288_v24 = vsel %vm1301_vm4, %v5374_v20, %v2953_v51  ;;  %v4308_v31 = vld [vmem:[#allocation2 + $0x98] sm:$0xff]  ;;  %v5434_v20 = vunpack.i.l.bf16 %v4179_v3  ;;  %v982_v3 = vsel %vm979_vm2, %v3687_v60, %v3819_v38 }
 0x1fa   : > { %5433 = vst [vmem:[#allocation28_spill] sm:$0xff] %v4288_v24  ;;  %2737 = vmatpush.msk.msra.mxu1 %vm4246_vm5, %v4034_v22 }
 0x1fb   : > { %2841 = vmatpush.msk.msra.mxu3 %vm4246_vm5, %v4034_v22  ;;  %v4296_v12 = vpop.permute.xlu0 %1442 }
 0x1fc   : > { %1573 = vrot.lane.b32.xlu1 %v4298_v28, %s3138_s30  ;;  %2738 = vmatpush.msk.msra.mxu1 %vm4246_vm5, %v4018_v54 }
 0x1fd   : > { %2842 = vmatpush.msk.msra.mxu3 %vm4246_vm5, %v4018_v54 }
 0x1fe   : > { %2739 = vmatpush.msk.msra.mxu1 %vm4246_vm5, %v4007_v0  ;;  %v2967_v22 = vpop.permute.xlu1 %2966 }
 0x1ff   : > { %1903 = vrot.lane.b32.xlu2 %v4308_v31, %s3139_s7  ;;  %2843 = vmatpush.msk.msra.mxu3 %vm4246_vm5, %v4007_v0  ;;  %v2969_v37 = vunpack.i.h.bf16 %v2967_v22  ;;  %v2968_v51 = vunpack.i.l.bf16 %v2967_v22 }
 0x200   : > { %2740 = vmatpush.msk.msra.mxu1 %vm4246_vm5, %v3979_v49 }
 0x201   : > { %v4322_v54 = vpop.permute.xlu2 %1428  ;;  %2844 = vmatpush.msk.msra.mxu3 %vm4246_vm5, %v3979_v49  ;;  %1891 = vrot.lane.b32.xlu0 %v4181_v35, %s3139_s7  ;;  %v4332_v16 = vsel %vm1301_vm4, %v2969_v37, %v5434_v20  ;;  %v4337_v0 = vsel %vm1301_vm4, %v5376_v46, %v2968_v51  ;;  %v1832_v37 = vld [vmem:[#allocation2 + $0x78] sm:$0xff]  ;;  %v3073_v51 = vld [vmem:[%s5352_s1 + $0x8] sm:$0xff]  ;;  %v5378_v20 = vunpack.i.h.bf16 %v4170_v59 }
 0x202   : > { %5435 = vst [vmem:[#allocation29_spill] sm:$0xff] %v4337_v0  ;;  %2741 = vmatpush.msk.msra.mxu1 %vm4246_vm5, %v3953_v2  ;;  %v4369_v46 = vmul.f32 %v3073_v51, %v3761_v39 }
 0x203   : > { %2845 = vmatpush.msk.msra.mxu3 %vm4246_vm5, %v3953_v2  ;;  %v4345_v49 = vpop.permute.xlu0 %2991  ;;  %v980_v2 = vsel %vm979_vm2, %v3679_v17, %v3793_v33 }
 0x204   : > { %v2993_v22 = vunpack.i.l.bf16 %v4345_v49  ;;  %1565 = vrot.lane.b32.xlu1 %v4121_v41, %s3138_s30  ;;  %2742 = vmatpush.msk.msra.mxu1 %vm4246_vm5, %v982_v3  ;;  %v5436_v51 = vunpack.i.h.bf16 %v4345_v49 }
 0x205   : > { %2846 = vmatpush.msk.msra.mxu3 %vm4246_vm5, %v982_v3  ;;  %v3074_v3 = vld [vmem:[%s5352_s1 + $0xa8] sm:$0xff] }
 0x206   : > { %2743 = vmatpush.msk.msra.mxu1 %vm4246_vm5, %v980_v2  ;;  %v4363_v60 = vpop.permute.xlu1 %2981  ;;  %v4375_v17 = vmul.f32 %v3074_v3, %v3784_v11  ;;  %v1783_v63 = vsel %vm1768_vm6, %v2993_v22, %v5436_v51  ;;  %v1833_v3 = vld [vmem:[#allocation2 + $0x80] sm:$0xff] }
 0x207   : > { %1895 = vrot.lane.b32.xlu2 %v1832_v37, %s3139_s7  ;;  %2847 = vmatpush.msk.msra.mxu3 %vm4246_vm5, %v980_v2  ;;  %v2983_v8 = vunpack.i.l.bf16 %v4363_v60 }
 0x208   : > { %2251 = vmatmul.f32.vlgmr.msra.gmra.mxu1 %v4369_v46  ;;  %2263 = vmatmul.f32.vlgmr.msra.gmra.mxu3 %v4375_v17 }
 0x209   : > { %v4387_v24 = vpop.permute.xlu2 %1422  ;;  %2317 = vmatpush.msrb.mxu3 %v1783_v63  ;;  %2399 = vmatpush.msrb.mxu1 %v3797_v1  ;;  %v4393_v37 = vsel %vm1301_vm4, %v5378_v20, %v2983_v8 }
 0x20a   : > { %5437 = vst [vmem:[#allocation30_spill] sm:$0xff] %v4393_v37  ;;  %1877 = vrot.lane.b32.xlu0 %v4252_v7, %s3139_s7 }
 0x20b   : > { %2400 = vmatpush.msrb.mxu1 %v3789_v62  ;;  %v4398_v2 = vpop.permute.xlu0 %2996  ;;  %v3075_v62 = vld [vmem:[%s5352_s1 + $0x30] sm:$0xff] }
 0x20c   : > { %v5377_v22 = vunpack.i.h.bf16 %v4398_v2  ;;  %v2998_v51 = vunpack.i.l.bf16 %v4398_v2  ;;  %1897 = vrot.lane.b32.xlu1 %v1833_v3, %s3139_s7  ;;  %v4411_v8 = vmul.f32 %v3075_v62, %v3810_v58 }
 0x20d   : > { %2401 = vmatpush.msrb.mxu1 %v3778_v42  ;;  %v3076_v42 = vld [vmem:[%s5352_s1 + $0xd0] sm:$0xff] }
 0x20e   : > { %v1441_v1 = vpop.permute.xlu1 %1440  ;;  %v1781_v63 = vsel %vm1768_vm6, %v2998_v51, %v5377_v22  ;;  %v4420_v7 = vmul.f32 %v3076_v42, %v3880_v36 }
 0x20f   : > { %1561 = vrot.lane.b32.xlu2 %v4110_v30, %s3138_s30  ;;  %2402 = vmatpush.msrb.mxu1 %v3769_v9  ;;  %v1461_v51 = vsel %vm1446_vm7, %v1441_v1, %v4296_v12  ;;  %v697_v9 = vperm.slane %v3817_v44, 1  ;;  %v1826_v44 = vld [vmem:[#allocation2 + $0x48] sm:$0xff] }
 0x210   : > { %5438 = vst [vmem:[#allocation31_spill] sm:$0xff] %v4420_v7  ;;  %2318 = vmatpush.msrb.mxu3 %v1781_v63  ;;  %2254 = vmatmul.f32.gmra.mxu1 %v4411_v8  ;;  %v1829_v63 = vld [vmem:[#allocation2 + $0x60] sm:$0xff] }
 0x211   : > { %v4425_v62 = vpop.permute.xlu2 %1416  ;;  %2266 = vmatmul.f32.gmra.mxu3 %v4420_v7  ;;  %2403 = vmatpush.msrb.mxu1 %v3752_v15  ;;  %vm4441_vm8 = vcmp.eq.s32.totalorder %v697_v9, 1  ;;  %v2978_v7 = vunpack.i.l.bf16 %v4170_v59  ;;  %v2948_v59 = vunpack.i.l.bf16 %v4131_v29 }
 0x212   : > { %1873 = vrot.lane.b32.xlu0 %v4106_v43, %s3139_s7  ;;  %2744 = vmatpush.msk.msrb.mxu2 %vm4246_vm5, %v1461_v51  ;;  %v3077_v51 = vld [vmem:[%s5352_s1 + $0x58] sm:$0xff] }
 0x213   : > { %2404 = vmatpush.msrb.mxu1 %v3757_v45  ;;  %v4435_v1 = vpop.permute.xlu0 %3001  ;;  %v4454_v61 = vmul.f32 %v3077_v51, %v3848_v13 }
 0x214   : > { %5439 = vst [vmem:[#allocation32_spill] sm:$0xff] %v4435_v1  ;;  %v5381_v42 = vunpack.i.h.bf16 %v4435_v1  ;;  %v3003_v22 = vunpack.i.l.bf16 %v4435_v1  ;;  %1889 = vrot.lane.b32.xlu1 %v1829_v63, %s3139_s7  ;;  %v693_v63 = vld [vmem:[#allocation2 + $0xb0] sm:$0xff]  ;;  %v2963_v1 = vunpack.i.l.bf16 %v4145_v57 }
 0x215   : > { %2405 = vmatpush.msrb.mxu1 %v3735_v53  ;;  %v3078_v53 = vld [vmem:[%s5352_s1 + $0xf8] sm:$0xff] }
 0x216   : > { %v4445_v20 = vpop.permute.xlu1 %1436  ;;  %v1779_v45 = vsel %vm1768_vm6, %v3003_v22, %v5381_v42  ;;  %v4462_v9 = vmul.f32 %v3078_v53, %v3803_v27  ;;  %v4583_v42 = vld [vmem:[#allocation2 + $0x10] sm:$0xff] }
 0x217   : > { %1883 = vrot.lane.b32.xlu2 %v1826_v44, %s3139_s7  ;;  %2406 = vmatpush.msrb.mxu1 %v3724_v19  ;;  %v1459_v22 = vsel %vm1446_vm7, %v4273_v47, %v4445_v20  ;;  %v4473_v19 = vld [vmem:[#allocation2 + $0xb8] sm:$0xff] }
 0x218   : > { %5442 = vst [vmem:[#allocation33_spill] sm:$0xff] %v4462_v9  ;;  %2319 = vmatpush.msrb.mxu3 %v1779_v45  ;;  %2257 = vmatmul.f32.gmra.mxu1 %v4454_v61 }
 0x219   : > { %v4468_v51 = vpop.permute.xlu2 %1410  ;;  %2269 = vmatmul.f32.gmra.mxu3 %v4462_v9  ;;  %2768 = vmatpush.msk.msrb.mxu1 %vm4441_vm8, %v693_v63 }
 0x21a   : > { %1444 = vrot.lane.b32.xlu0 %v4473_v19, %s3136_s24  ;;  %2745 = vmatpush.msk.msrb.mxu2 %vm4246_vm5, %v1459_v22 }
 0x21b   : > { %2769 = vmatpush.msk.msrb.mxu1 %vm4441_vm8, %v4308_v31  ;;  %v4482_v47 = vpop.permute.xlu0 %3006  ;;  %v3079_v31 = vld [vmem:[%s5352_s1 + $0x80] sm:$0xff] }
 0x21c   : > { %5443 = vst [vmem:[#allocation34_spill] sm:$0xff] %v4482_v47  ;;  %v5379_v44 = vunpack.i.h.bf16 %v4482_v47  ;;  %v3008_v45 = vunpack.i.l.bf16 %v4482_v47  ;;  %1885 = vrot.lane.b32.xlu1 %v4195_v4, %s3139_s7  ;;  %v4499_v63 = vmul.f32 %v3079_v31, %v3773_v50 }
 0x21d   : > { %2770 = vmatpush.msk.msrb.mxu1 %vm4441_vm8, %v1833_v3  ;;  %v3080_v3 = vld [vmem:[%s5352_s1 + $0x120] sm:$0xff] }
 0x21e   : > { %v4490_v53 = vpop.permute.xlu1 %1430  ;;  %v1777_v22 = vsel %vm1768_vm6, %v3008_v45, %v5379_v44  ;;  %v4510_v45 = vmul.f32 %v3080_v3, %v3925_v23 }
 0x21f   : > { %1879 = vrot.lane.b32.xlu2 %v4298_v28, %s3139_s7  ;;  %2771 = vmatpush.msk.msrb.mxu1 %vm4441_vm8, %v4181_v35  ;;  %v1457_v44 = vsel %vm1446_vm7, %v4322_v54, %v4490_v53  ;;  %v4520_v35 = vld [vmem:[#allocation2 + $0x70] sm:$0xff] }
 0x220   : > { %5444 = vst [vmem:[#allocation35_spill] sm:$0xff] %v4510_v45  ;;  %2320 = vmatpush.msrb.mxu3 %v1777_v22  ;;  %2260 = vmatmul.f32.gmra.mxu1 %v4499_v63 }
 0x221   : > { %v1405_v31 = vpop.permute.xlu2 %1404  ;;  %2272 = vmatmul.f32.gmra.mxu3 %v4510_v45  ;;  %2772 = vmatpush.msk.msrb.mxu1 %vm4441_vm8, %v4195_v4 }
 0x222   : > { %1426 = vrot.lane.b32.xlu0 %v4520_v35, %s3136_s24  ;;  %2746 = vmatpush.msk.msrb.mxu2 %vm4246_vm5, %v1457_v44 }
 0x223   : > { %2773 = vmatpush.msk.msrb.mxu1 %vm4441_vm8, %v4298_v28  ;;  %v4529_v54 = vpop.permute.xlu0 %3011  ;;  %v4554_v28 = vld [vmem:[#allocation2 + $0x40] sm:$0xff] }
 0x224   : > { %5445 = vst [vmem:[#allocation36_spill] sm:$0xff] %v4529_v54  ;;  %v5380_v22 = vunpack.i.h.bf16 %v4529_v54  ;;  %v3013_v3 = vunpack.i.l.bf16 %v4529_v54  ;;  %1871 = vrot.lane.b32.xlu1 %v4121_v41, %s3139_s7  ;;  %v4609_v54 = vld [vmem:[#allocation2 + $0x28] sm:$0xff] }
 0x225   : > { %2774 = vmatpush.msk.msrb.mxu1 %vm4441_vm8, %v4106_v43 }
 0x226   : > { %v4538_v4 = vpop.permute.xlu1 %1424  ;;  %v1775_v44 = vsel %vm1768_vm6, %v3013_v3, %v5380_v22 }
 0x227   : > { %1865 = vrot.lane.b32.xlu2 %v4271_v14, %s3139_s7  ;;  %2775 = vmatpush.msk.msrb.mxu1 %vm4441_vm8, %v4110_v30  ;;  %v1455_v41 = vsel %vm1446_vm7, %v4387_v24, %v4538_v4 }
 0x228   : > { %2321 = vmatpush.msrb.mxu3 %v1775_v44  ;;  %2415 = vmatmul.f32.vlgmr.msrb.gmra.mxu1 %v3910_v10  ;;  %v4566_v10 = vld [vmem:[#allocation2 + $0xa0] sm:$0xff] }
 0x229   : > { %v4552_v43 = vpop.permute.xlu2 %1400  ;;  %2747 = vmatpush.msk.msrb.mxu2 %vm4246_vm5, %v1455_v41  ;;  %v3030_v9 = vpack.i.bf16 %v4566_v10, %v4473_v19 }
 0x22a   : > { %1414 = vrot.lane.b32.xlu0 %v4554_v28, %s3136_s24  ;;  %v1447_v0 = vsel %vm1446_vm7, %v4215_v48, %v4552_v43 }
 0x22b   : > { %v4560_v14 = vpop.permute.xlu0 %3016 }
 0x22c   : > { %5446 = vst [vmem:[#allocation37_spill] sm:$0xff] %v4560_v14  ;;  %v5382_v3 = vunpack.i.h.bf16 %v4560_v14  ;;  %v3018_v22 = vunpack.i.l.bf16 %v4560_v14  ;;  %1867 = vrot.lane.b32.xlu1 %v4110_v30, %s3139_s7 }
 0x22e   : > { %v4568_v24 = vpop.permute.xlu1 %1418  ;;  %v1773_v44 = vsel %vm1768_vm6, %v3018_v22, %v5382_v3  ;;  %v1367_v3 = vld [vmem:[#allocation2 + $0x88] sm:$0xff] }
 0x22f   : > { %1438 = vrot.lane.b32.xlu2 %v4566_v10, %s3136_s24  ;;  %2322 = vmatpush.msrb.mxu3 %v1773_v44  ;;  %v1453_v41 = vsel %vm1446_vm7, %v4425_v62, %v4568_v24  ;;  %v4590_v44 = vld [vmem:[#allocation2 + $0x58] sm:$0xff] }
 0x230   : > { %2418 = vmatmul.f32.gmra.mxu1 %v3938_v32  ;;  %2748 = vmatpush.msk.msrb.mxu2 %vm4246_vm5, %v1453_v41  ;;  %v5447_v41 = vld [vmem:[#allocation13_spill] sm:$0xff]  ;;  %v3040_v48 = vpack.i.bf16 %v4554_v28, %v4590_v44 }
 0x231   : > { %v4581_v30 = vpop.permute.xlu2 %1601 }
 0x232   : > { %1402 = vrot.lane.b32.xlu0 %v4583_v42, %s3136_s24 }
 0x233   : > { %v4587_v22 = vpop.permute.xlu0 %3026 }
 0x234   : > { %1432 = vrot.lane.b32.xlu1 %v1367_v3, %s3136_s24 }
 0x236   : > { %v4592_v62 = vpop.permute.xlu1 %1412 }
 0x237   : > { %1420 = vrot.lane.b32.xlu2 %v4590_v44, %s3136_s24  ;;  %v1451_v32 = vsel %vm1446_vm7, %v4468_v51, %v4592_v62  ;;  %v2984_v51 = vunpack.i.h.bf16 %v4363_v60  ;;  %v3035_v60 = vpack.i.bf16 %v4520_v35, %v1367_v3 }
 0x238   : > { %2421 = vmatmul.f32.gmra.mxu1 %v5447_v41  ;;  %2749 = vmatpush.msk.msrb.mxu2 %vm4246_vm5, %v1451_v32  ;;  %v5448_v41 = vld [vmem:[#allocation5_spill] sm:$0xff] }
 0x239   : > { %v4602_v45 = vpop.permute.xlu2 %1597 }
 0x23a   : > { %1605 = vrot.lane.b32.xlu0 %v4473_v19, %s3138_s30 }
 0x23b   : > { %v1596_v14 = vpop.permute.xlu0 %1595 }
 0x23c   : > { %3031 = vrot.lane.b32.xlu1 %v3030_v9, %s3137_s29 }
 0x23e   : > { %v4611_v47 = vpop.permute.xlu1 %1406 }
 0x23f   : > { %1408 = vrot.lane.b32.xlu2 %v4609_v54, %s3136_s24  ;;  %v1449_v32 = vsel %vm1446_vm7, %v1405_v31, %v4611_v47 }
 0x240   : > { %2424 = vmatmul.f32.gmra.mxu1 %v5448_v41  ;;  %2750 = vmatpush.msk.msrb.mxu2 %vm4246_vm5, %v1449_v32  ;;  %v5449_v41 = vunpack.i.l.bf16 %v4236_v55 }
 0x241   : > { %v4622_v9 = vpop.permute.xlu2 %1583 }
 0x242   : > { %1593 = vrot.lane.b32.xlu0 %v1367_v3, %s3138_s30  ;;  %2751 = vmatpush.msk.msrb.mxu2 %vm4246_vm5, %v1447_v0  ;;  %v1316_v32 = vsel %vm1301_vm4, %v2984_v51, %v5449_v41  ;;  %v1314_v0 = vsel %vm1301_vm4, %v2978_v7, %v5450_v34  ;;  %v3028_v41 = vunpack.i.l.bf16 %v4587_v22  ;;  %v5452_v7 = vunpack.i.h.bf16 %v4145_v57 }
 0x243   : > { %v4631_v31 = vpop.permute.xlu0 %1591  ;;  %v5453_v57 = vunpack.i.h.bf16 %v4587_v22 }
 0x244   : > { %3036 = vrot.lane.b32.xlu1 %v3035_v60, %s3137_s29  ;;  %2284 = vmatpush.msrb.mxu2 %v1316_v32  ;;  %v5451_v32 = vld [vmem:[#allocation10_spill] sm:$0xff] }
 0x246   : > { %v4643_v37 = vpop.permute.xlu1 %3021  ;;  %2285 = vmatpush.msrb.mxu2 %v1314_v0 }
 0x247   : > { %3041 = vrot.lane.b32.xlu2 %v3040_v48, %s3137_s29  ;;  %v5390_v55 = vunpack.i.h.bf16 %v4643_v37  ;;  %v3023_v51 = vunpack.i.l.bf16 %v4643_v37  ;;  %v1310_v48 = vsel %vm1301_vm4, %v2963_v1, %v5452_v7  ;;  %v2933_v1 = vunpack.i.l.bf16 %v4117_v6 }
 0x248   : > { %2427 = vmatmul.f32.gmra.mxu1 %v5451_v32  ;;  %2286 = vmatpush.msrb.mxu2 %v4332_v16  ;;  %v3045_v32 = vpack.i.bf16 %v4583_v42, %v4609_v54  ;;  %v1769_v16 = vsel %vm1768_vm6, %v3028_v41, %v5453_v57  ;;  %v5457_v57 = vld [vmem:[#allocation14_spill] sm:$0xff] }
 0x249   : > { %v4653_v34 = vpop.permute.xlu2 %1579  ;;  %v1771_v0 = vsel %vm1768_vm6, %v3023_v51, %v5390_v55  ;;  %v5454_v51 = vunpack.i.h.bf16 %v4131_v29  ;;  %v5456_v29 = vunpack.i.h.bf16 %v4117_v6 }
 0x24a   : > { %1899 = vrot.lane.b32.xlu0 %v1367_v3, %s3139_s7  ;;  %2287 = vmatpush.msrb.mxu2 %v1310_v48  ;;  %v5455_v48 = vld [vmem:[#allocation11_spill] sm:$0xff] }
 0x24b   : > { %v1578_v60 = vpop.permute.xlu0 %1577  ;;  %2323 = vmatpush.msrb.mxu3 %v1771_v0  ;;  %v1306_v3 = vsel %vm1301_vm4, %v2948_v59, %v5454_v51  ;;  %v1302_v59 = vsel %vm1301_vm4, %v2933_v1, %v5456_v29  ;;  %v3081_v0 = vld [vmem:[%s5352_s1 + $0x10] sm:$0xff]  ;;  %v5462_v29 = vld [vmem:[#allocation16_spill] sm:$0xff] }
 0x24c   : > { %3046 = vrot.lane.b32.xlu1 %v3045_v32, %s3137_s29  ;;  %2288 = vmatpush.msrb.mxu2 %v4283_v40  ;;  %v4693_v32 = vmul.f32 %v3081_v0, %v3761_v39  ;;  %v5460_v51 = vld [vmem:[#allocation22_spill] sm:$0xff] }
 0x24d   : > { %2324 = vmatpush.msrb.mxu3 %v1769_v16  ;;  %v5458_v16 = vld [vmem:[#allocation24_spill] sm:$0xff] }
 0x24e   : > { %v4673_v7 = vpop.permute.xlu1 %1603  ;;  %2289 = vmatpush.msrb.mxu2 %v1306_v3  ;;  %v904_v3 = vperm.slane %v5429_v52, 1 }
 0x24f   : > { %1599 = vrot.lane.b32.xlu2 %v4566_v10, %s3138_s30  ;;  %v1622_v40 = vsel %vm1607_vm9, %v4581_v30, %v4673_v7 }
 0x250   : > { %2430 = vmatmul.f32.gmra.mxu1 %v5455_v48  ;;  %2290 = vmatpush.msrb.mxu2 %v4225_v21  ;;  %v1620_v21 = vsel %vm1607_vm9, %v1596_v14, %v4602_v45  ;;  %vm4756_vm10 = vcmp.eq.s32.totalorder %v904_v3, 1  ;;  %v5469_v3 = vld [vmem:[#allocation6_spill] sm:$0xff] }
 0x251   : > { %v4682_v41 = vpop.permute.xlu2 %1571  ;;  %2752 = vmatpush.msk.msrb.mxu3 %vm3839_vm1, %v1622_v40  ;;  %v5461_v40 = vld [vmem:[#allocation21_spill] sm:$0xff] }
 0x252   : > { %1575 = vrot.lane.b32.xlu0 %v4554_v28, %s3138_s30  ;;  %2291 = vmatpush.msrb.mxu2 %v1302_v59  ;;  %v5463_v59 = vld [vmem:[#allocation20_spill] sm:$0xff] }
 0x253   : > { %v4699_v30 = vpop.permute.xlu0 %1909  ;;  %2753 = vmatpush.msk.msrb.mxu3 %vm3839_vm1, %v1620_v21  ;;  %2292 = vmatmul.f32.vlgmr.msrb.gmra.mxu2 %v4693_v32  ;;  %v3083_v21 = vld [vmem:[%s5352_s1 + $0x60] sm:$0xff] }
 0x254   : > { %2776 = vmatpush.msk.msra.mxu2 %vm4441_vm8, %v4163_v18  ;;  %1911 = vrot.lane.b32.xlu1 %v4473_v19, %s3139_s7 }
 0x256   : > { %2777 = vmatpush.msk.msra.mxu2 %vm4441_vm8, %v4143_v25  ;;  %v1590_v6 = vpop.permute.xlu1 %1589  ;;  %v3082_v25 = vld [vmem:[%s5352_s1 + $0x38] sm:$0xff] }
 0x257   : > { %1905 = vrot.lane.b32.xlu2 %v4566_v10, %s3139_s7  ;;  %v1618_v14 = vsel %vm1607_vm9, %v1590_v6, %v4631_v31  ;;  %v4728_v19 = vmul.f32 %v3082_v25, %v3810_v58  ;;  %v5459_v10 = vld [vmem:[#allocation23_spill] sm:$0xff]  ;;  %v5468_v25 = vld [vmem:[#allocation17_spill] sm:$0xff] }
 0x258   : > { %2433 = vmatmul.f32.gmra.mxu1 %v5457_v57  ;;  %2778 = vmatpush.msk.msra.mxu2 %vm4441_vm8, %v5458_v16  ;;  %v5466_v6 = vld [vmem:[#allocation19_spill] sm:$0xff]  ;;  %v5467_v16 = vld [vmem:[#allocation18_spill] sm:$0xff] }
 0x259   : > { %v4720_v18 = vpop.permute.xlu2 %1903  ;;  %2754 = vmatpush.msk.msrb.mxu3 %vm3839_vm1, %v1618_v14  ;;  %v1614_v14 = vsel %vm1607_vm9, %v1578_v60, %v4653_v34  ;;  %v2124_v60 = vld [vmem:[%s5354_s3 + $0x10] sm:$0xff] }
 0x25a   : > { %1881 = vrot.lane.b32.xlu0 %v4554_v28, %s3139_s7  ;;  %2779 = vmatpush.msk.msra.mxu2 %vm4441_vm8, %v5459_v10 }
 0x25b   : > { %v1902_v1 = vpop.permute.xlu0 %1901  ;;  %2295 = vmatmul.f32.gmra.mxu2 %v4728_v19 }
 0x25c   : > { %2780 = vmatpush.msk.msra.mxu2 %vm4441_vm8, %v5460_v51  ;;  %1587 = vrot.lane.b32.xlu1 %v4520_v35, %s3138_s30 }
 0x25e   : > { %2781 = vmatpush.msk.msra.mxu2 %vm4441_vm8, %v5461_v40  ;;  %v4745_v28 = vpop.permute.xlu1 %1585 }
 0x25f   : > { %1581 = vrot.lane.b32.xlu2 %v4590_v44, %s3138_s30  ;;  %v1616_v48 = vsel %vm1607_vm9, %v4622_v9, %v4745_v28  ;;  %v4768_v9 = vmul.f32 %v3083_v21, %v3848_v13  ;;  %v5471_v21 = vld [vmem:[#allocation15_spill] sm:$0xff] }
 0x260   : > { %2436 = vmatmul.f32.gmra.mxu1 %v5462_v29  ;;  %2782 = vmatpush.msk.msra.mxu2 %vm4441_vm8, %v5463_v59  ;;  %v1926_v29 = vsel %vm1913_vm11, %v1902_v1, %v4720_v18  ;;  %v5473_v1 = vld [vmem:[#allocation9_spill] sm:$0xff] }
 0x261   : > { %v4760_v0 = vpop.permute.xlu2 %1895  ;;  %2755 = vmatpush.msk.msrb.mxu3 %vm3839_vm1, %v1616_v48  ;;  %v5470_v48 = vld [vmem:[#allocation7_spill] sm:$0xff] }
 0x262   : > { %1869 = vrot.lane.b32.xlu0 %v4583_v42, %s3139_s7  ;;  %2783 = vmatpush.msk.msra.mxu2 %vm4441_vm8, %v5466_v6  ;;  %v5472_v6 = vld [vmem:[#allocation12_spill] sm:$0xff] }
 0x263   : > { %v4777_v57 = vpop.permute.xlu0 %1567  ;;  %2756 = vmatpush.msk.msrb.mxu3 %vm3839_vm1, %v1614_v14  ;;  %2298 = vmatmul.f32.gmra.mxu2 %v4768_v9 }
 0x264   : > { %2784 = vmatpush.msk.msra.mxu2 %vm4756_vm10, %v5467_v16  ;;  %1893 = vrot.lane.b32.xlu1 %v4520_v35, %s3139_s7  ;;  %v983_v16 = vsel %vm979_vm2, %v3819_v38, %v5473_v1  ;;  %v3087_v1 = vld [vmem:[%s5352_s1 + $0x18] sm:$0xff] }
 0x266   : > { %2785 = vmatpush.msk.msra.mxu2 %vm4756_vm10, %v5468_v25  ;;  %v1908_v10 = vpop.permute.xlu1 %1907  ;;  %v2127_v25 = vld [vmem:[%s5354_s3 + $0x28] sm:$0xff] }
 0x267   : > { %1887 = vrot.lane.b32.xlu2 %v4590_v44, %s3139_s7  ;;  %v1928_v51 = vsel %vm1913_vm11, %v1908_v10, %v4699_v30  ;;  %v3084_v44 = vld [vmem:[%s5352_s1 + $0x88] sm:$0xff] }
 0x268   : > { %2786 = vmatpush.msk.msra.mxu2 %vm4756_vm10, %v5469_v3  ;;  %2760 = vmatpush.msk.msrb.mxu0 %vm4246_vm5, %v1928_v51  ;;  %v4808_v40 = vmul.f32 %v3084_v44, %v3773_v50  ;;  %v5474_v51 = vld [vmem:[#allocation8_spill] sm:$0xff] }
 0x269   : > { %v4802_v35 = vpop.permute.xlu2 %1561  ;;  %v981_v38 = vsel %vm979_vm2, %v3793_v33, %v5474_v51  ;;  %v2122_v33 = vld [vmem:[%s5354_s3] sm:$0xff] }
 0x26a   : > { %2142 = vperm.xlu0 %2928, %v2124_v60   ;;  %2787 = vmatpush.msk.msra.mxu2 %vm4756_vm10, %v5470_v48 }
 0x26b   : > { %v1560_v59 = vpop.permute.xlu0 %1559  ;;  %2761 = vmatpush.msk.msrb.mxu0 %vm4246_vm5, %v1926_v29  ;;  %2301 = vmatmul.f32.gmra.mxu2 %v4808_v40 }
 0x26c   : > { %2788 = vmatpush.msk.msra.mxu2 %vm4756_vm10, %v5471_v21  ;;  %1569 = vrot.lane.b32.xlu1 %v4609_v54, %s3138_s30  ;;  %v1608_v21 = vsel %vm1607_vm9, %v1560_v59, %v4802_v35 }
 0x26e   : > { %2789 = vmatpush.msk.msra.mxu2 %vm4756_vm10, %v5472_v6  ;;  %v4826_v14 = vpop.permute.xlu1 %1573 }
 0x26f   : > { %1563 = vrot.lane.b32.xlu2 %v4583_v42, %s3138_s30  ;;  %v1612_v10 = vsel %vm1607_vm9, %v4682_v41, %v4826_v14  ;;  %v3085_v42 = vld [vmem:[%s5352_s1 + $0xb0] sm:$0xff] }
 0x270   : > { %2790 = vmatpush.msk.msra.mxu2 %vm4756_vm10, %v983_v16  ;;  %2757 = vmatpush.msk.msrb.mxu3 %vm3839_vm1, %v1612_v10  ;;  %v4850_v3 = vmul.f32 %v3085_v42, %v3784_v11  ;;  %v4880_v16 = vmul.f32 %v3087_v1, %v3761_v39  ;;  %v2125_v10 = vld [vmem:[%s5354_s3 + $0x18] sm:$0xff]  ;;  %v4903_v42 = vmul.f32 %v3088_v56, %v3803_v27  ;;  %v3091_v56 = vld [vmem:[%s5352_s1 + $0x68] sm:$0xff] }
 0x271   : > { %v1884_v60 = vpop.permute.xlu2 %1883 }
 0x272   : > { %2157 = vperm.xlu0 %2928, %v2127_v25   ;;  %2791 = vmatpush.msk.msra.mxu2 %vm4756_vm10, %v981_v38  ;;  %v2123_v25 = vld [vmem:[%s5354_s3 + $0x8] sm:$0xff] }
 0x273   : > { %v4854_v41 = vpop.permute.xlu0 %1891  ;;  %2304 = vmatmul.f32.gmra.mxu2 %v4850_v3 }
 0x274   : > { %1875 = vrot.lane.b32.xlu1 %v4609_v54, %s3139_s7  ;;  %v3086_v54 = vld [vmem:[%s5352_s1 + $0xd8] sm:$0xff] }
 0x275   : > { %v4874_v6 = vmul.f32 %v3086_v54, %v3880_v36  ;;  %v2128_v54 = vld [vmem:[%s5354_s3 + $0x30] sm:$0xff] }
 0x276   : > { %v1566_v44 = vpop.permute.xlu1 %1565 }
 0x277   : > { %2132 = vperm.xlu2 %2927, %v2122_v33   ;;  %v1610_v48 = vsel %vm1607_vm9, %v1566_v44, %v4777_v57  ;;  %v3089_v33 = vld [vmem:[%s5352_s1 + $0x40] sm:$0xff] }
 0x278   : > { %2758 = vmatpush.msk.msrb.mxu3 %vm3839_vm1, %v1610_v48  ;;  %v4909_v44 = vmul.f32 %v3089_v33, %v3810_v58  ;;  %v4935_v33 = vmul.f32 %v3091_v56, %v3848_v13 }
 0x279   : > { %v4866_v29 = vpop.permute.xlu2 %1879 }
 0x27a   : > { %2759 = vmatpush.msk.msrb.mxu3 %vm3839_vm1, %v1608_v21 }
 0x27b   : > { %2307 = vmatmul.f32.gmra.mxu2 %v4874_v6  ;;  %2333 = vmatmul.f32.vlgmr.msrb.gmra.mxu3 %v4880_v16 }
 0x27c   : > { %v1878_v59 = vpop.permute.xlu0 %1877  ;;  %2137 = vperm.xlu1 %2929, %v2123_v25  }
 0x27e   : > { %v4892_v51 = vpop.permute.xlu1 %1897 }
 0x27f   : > { %2147 = vperm.xlu2 %2927, %v2125_v10   ;;  %v1924_v38 = vsel %vm1913_vm11, %v4760_v0, %v4892_v51  ;;  %v2126_v0 = vld [vmem:[%s5354_s3 + $0x20] sm:$0xff]  ;;  %v3090_v10 = vld [vmem:[%s5352_s1 + $0x128] sm:$0xff] }
 0x280   : > { %2762 = vmatpush.msk.msrb.mxu0 %vm4246_vm5, %v1924_v38  ;;  %v4929_v38 = vmul.f32 %v3090_v10, %v3925_v23 }
 0x281   : > { %v1866_v48 = vpop.permute.xlu2 %1865 }
 0x283   : > { %2310 = vmatmul.f32.gmra.mxu2 %v4903_v42  ;;  %2336 = vmatmul.f32.gmra.mxu3 %v4909_v44 }
 0x284   : > { %v4916_v21 = vpop.permute.xlu0 %1873  ;;  %2152 = vperm.xlu1 %2929, %v2126_v0   ;;  %v2129_v0 = vld [vmem:[%s5354_s3 + $0x38] sm:$0xff] }
 0x286   : > { %v1890_v1 = vpop.permute.xlu1 %1889 }
 0x287   : > { %2162 = vperm.xlu2 %2927, %v2128_v54   ;;  %v1922_v25 = vsel %vm1913_vm11, %v1890_v1, %v4854_v41 }
 0x288   : > { %2763 = vmatpush.msk.msrb.mxu0 %vm4246_vm5, %v1922_v25 }
 0x289   : > { %v1439_v54 = vpop.permute.xlu2 %1438 }
 0x28a   : > { %v1460_v56 = vsel %vm1446_vm7, %v4445_v20, %v1439_v54  ;;  %v3093_v54 = vld [vmem:[%s5352_s1 + $0xb8] sm:$0xff] }
 0x28b   : > { %2313 = vmatmul.f32.gmra.mxu2 %v4929_v38  ;;  %2339 = vmatmul.f32.gmra.mxu3 %v4935_v33 }
 0x28c   : > { %v1445_v1 = vpop.permute.xlu0 %1444  ;;  %2167 = vperm.xlu1 %2929, %v2129_v0   ;;  %v3092_v0 = vld [vmem:[%s5352_s1 + $0x90] sm:$0xff] }
 0x28d   : > { %v1462_v25 = vsel %vm1446_vm7, %v4296_v12, %v1445_v1  ;;  %v1918_v12 = vsel %vm1913_vm11, %v1878_v59, %v4866_v29  ;;  %v4962_v1 = vmul.f32 %v3092_v0, %v3773_v50  ;;  %v3094_v0 = vld [vmem:[%s5352_s1 + $0x20] sm:$0xff] }
 0x28e   : > { %2792 = vmatpush.msk.msra.mxu3 %vm4756_vm10, %v1462_v25  ;;  %v4946_v10 = vpop.permute.xlu1 %1885  ;;  %v4976_v25 = vmul.f32 %v3093_v54, %v3784_v11 }
 0x28f   : > { %v1920_v55 = vsel %vm1913_vm11, %v1884_v60, %v4946_v10 }
 0x290   : > { %2793 = vmatpush.msk.msra.mxu3 %vm4756_vm10, %v1460_v56  ;;  %2764 = vmatpush.msk.msrb.mxu0 %vm4246_vm5, %v1920_v55 }
 0x291   : > { %v1421_v59 = vpop.permute.xlu2 %1420 }
 0x292   : > { %2765 = vmatpush.msk.msrb.mxu0 %vm4246_vm5, %v1918_v12 }
 0x293   : > { %2342 = vmatmul.f32.gmra.mxu3 %v4962_v1  ;;  %2456 = vmatmul.f32.vlgmr.msra.gmra.mxu2 %v4369_v46 }
 0x294   : > { %v1427_v20 = vpop.permute.xlu0 %1426 }
 0x296   : > { %v1872_v60 = vpop.permute.xlu1 %1871 }
 0x297   : > { %v1916_v55 = vsel %vm1913_vm11, %v1872_v60, %v4916_v21  ;;  %v4988_v60 = vmul.f32 %v3094_v0, %v3761_v39 }
 0x298   : > { %2766 = vmatpush.msk.msrb.mxu0 %vm4246_vm5, %v1916_v55 }
 0x29b   : > { %2345 = vmatmul.f32.gmra.mxu3 %v4976_v25  ;;  %2459 = vmatmul.f32.gmra.mxu2 %v4411_v8  ;;  %v3095_v8 = vld [vmem:[%s5352_s1 + $0xe0] sm:$0xff] }
 0x29c   : > { %v1415_v46 = vpop.permute.xlu0 %1414  ;;  %v4998_v55 = vmul.f32 %v3095_v8, %v3880_v36  ;;  %v1456_v8 = vsel %vm1446_vm7, %v4538_v4, %v1427_v20 }
 0x29d   : > { %v1452_v20 = vsel %vm1446_vm7, %v4592_v62, %v1415_v46 }
 0x29e   : > { %v4980_v56 = vpop.permute.xlu1 %1867 }
 0x29f   : > { %v1914_v12 = vsel %vm1913_vm11, %v1866_v48, %v4980_v56  ;;  %v1409_v48 = vpop.permute.xlu2 %1408 }
 0x2a0   : > { %2767 = vmatpush.msk.msrb.mxu0 %vm4246_vm5, %v1914_v12  ;;  %v3096_v12 = vld [vmem:[%s5352_s1 + $0x48] sm:$0xff] }
 0x2a1   : > { %2700 = vmatmul.msk.f32.vlgmr.msrb.gmra.mxu0 %vm324_vm0, %v4988_v60  ;;  %v5008_v0 = vmul.f32 %v3096_v12, %v3810_v58  ;;  %v1454_v58 = vsel %vm1446_vm7, %v4568_v24, %v1421_v59 }
 0x2a3   : > { %2348 = vmatmul.f32.gmra.mxu3 %v4998_v55  ;;  %2462 = vmatmul.f32.gmra.mxu2 %v4454_v61  ;;  %v3097_v61 = vld [vmem:[%s5352_s1 + $0x108] sm:$0xff] }
 0x2a4   : > { %v1403_v39 = vpop.permute.xlu0 %1402 }
 0x2a5   : > { %v1448_v62 = vsel %vm1446_vm7, %v4552_v43, %v1403_v39  ;;  %v5476_v43 = vunpack.i.h.bf16 %v4398_v2 }
 0x2a6   : > { %v1433_v54 = vpop.permute.xlu1 %1432 }
 0x2a7   : > { %v1458_v26 = vsel %vm1446_vm7, %v4490_v53, %v1433_v54  ;;  %v5020_v53 = vmul.f32 %v3097_v61, %v3803_v27  ;;  %v3042_v4 = vpop.permute.xlu2 %3041 }
 0x2a8   : > { %2794 = vmatpush.msk.msra.mxu3 %vm4756_vm10, %v1458_v26  ;;  %v1450_v26 = vsel %vm1446_vm7, %v4611_v47, %v1409_v48  ;;  %v5475_v47 = vunpack.i.h.bf16 %v4345_v49  ;;  %v3099_v48 = vld [vmem:[%s5352_s1 + $0x130] sm:$0xff]  ;;  %v3043_v2 = vunpack.i.l.bf16 %v3042_v4 }
 0x2a9   : > { %2701 = vmatmul.msk.f32.gmra.mxu0 %vm324_vm0, %v5008_v0 }
 0x2aa   : > { %2795 = vmatpush.msk.msra.mxu3 %vm4756_vm10, %v1456_v8 }
 0x2ab   : > { %2351 = vmatmul.f32.gmra.mxu3 %v5020_v53  ;;  %2465 = vmatmul.f32.gmra.mxu2 %v4499_v63  ;;  %v3098_v63 = vld [vmem:[%s5352_s1 + $0x70] sm:$0xff] }
 0x2ac   : > { %2796 = vmatpush.msk.msra.mxu3 %vm4756_vm10, %v1454_v58  ;;  %v5040_v59 = vmul.f32 %v3098_v63, %v3848_v13  ;;  %v1606_v8 = vpop.permute.xlu0 %1605  ;;  %v5055_v13 = vmul.f32 %v3099_v48, %v3925_v23  ;;  %v5477_v58 = vld [vmem:[#allocation30_spill] sm:$0xff]  ;;  %v5482_v48 = vld [vmem:[#allocation31_spill] sm:$0xff] }
 0x2ae   : > { %v3032_v54 = vpop.permute.xlu1 %3031  ;;  %2797 = vmatpush.msk.msra.mxu3 %vm4756_vm10, %v1452_v20 }
 0x2af   : > { %v3034_v12 = vunpack.i.h.bf16 %v3032_v54  ;;  %v3033_v24 = vunpack.i.l.bf16 %v3032_v54  ;;  %v1600_v39 = vpop.permute.xlu2 %1599 }
 0x2b0   : > { %2798 = vmatpush.msk.msra.mxu3 %vm4756_vm10, %v1450_v26  ;;  %v3100_v26 = vld [vmem:[%s5352_s1 + $0x98] sm:$0xff] }
 0x2b1   : > { %2702 = vmatmul.msk.f32.gmra.mxu0 %vm324_vm0, %v5040_v59  ;;  %v1784_v46 = vsel %vm1768_vm6, %v5475_v47, %v3033_v24  ;;  %v1782_v49 = vsel %vm1768_vm6, %v5476_v43, %v3034_v12  ;;  %v5070_v24 = vmul.f32 %v3100_v26, %v3773_v50  ;;  %v5481_v47 = vld [vmem:[#allocation29_spill] sm:$0xff]  ;;  %v5483_v43 = vld [vmem:[#allocation34_spill] sm:$0xff] }
 0x2b2   : > { %2799 = vmatpush.msk.msra.mxu3 %vm4756_vm10, %v1448_v62  ;;  %2522 = vmatpush.msra.mxu0 %v1784_v46  ;;  %v3044_v46 = vunpack.i.h.bf16 %v3042_v4  ;;  %v5484_v50 = vunpack.i.h.bf16 %v5483_v43  ;;  %v5489_v4 = vld [vmem:[#allocation37_spill] sm:$0xff] }
 0x2b3   : > { %2354 = vmatmul.f32.gmra.mxu3 %v5055_v13  ;;  %2468 = vmatmul.f32.gmra.mxu2 %v4375_v17  ;;  %v5478_v17 = vld [vmem:[#allocation27_spill] sm:$0xff] }
 0x2b4   : > { %2489 = vmatpush.msra.mxu3 %v4260_v5  ;;  %2523 = vmatpush.msra.mxu0 %v1782_v49  ;;  %v5479_v5 = vld [vmem:[#allocation32_spill] sm:$0xff]  ;;  %v1594_v62 = vpop.permute.xlu0 %1593 }
 0x2b5   : > { %v5480_v12 = vunpack.i.h.bf16 %v5479_v5 }
 0x2b6   : > { %v3037_v61 = vpop.permute.xlu1 %3036  ;;  %2490 = vmatpush.msra.mxu3 %v5477_v58  ;;  %v5486_v58 = vld [vmem:[#allocation36_spill] sm:$0xff] }
 0x2b7   : > { %v3039_v20 = vunpack.i.h.bf16 %v3037_v61  ;;  %v3038_v54 = vunpack.i.l.bf16 %v3037_v61  ;;  %v5485_v61 = vld [vmem:[#allocation26_spill] sm:$0xff]  ;;  %v5487_v26 = vunpack.i.h.bf16 %v5486_v58  ;;  %v5493_v58 = vld [vmem:[#allocation4_spill] sm:$0xff] }
 0x2b8   : > { %2491 = vmatpush.msra.mxu3 %v5478_v17 }
 0x2b9   : > { %2703 = vmatmul.msk.f32.gmra.mxu0 %vm324_vm0, %v5070_v24  ;;  %v1780_v63 = vsel %vm1768_vm6, %v5480_v12, %v3038_v54  ;;  %v1778_v49 = vsel %vm1768_vm6, %v5484_v50, %v3039_v20  ;;  %v1776_v17 = vsel %vm1768_vm6, %v5487_v26, %v3043_v2  ;;  %v5488_v54 = vld [vmem:[#allocation28_spill] sm:$0xff]  ;;  %v1906_v50 = vpop.permute.xlu2 %1905  ;;  %v5492_v2 = vunpack.i.h.bf16 %v4643_v37 }
 0x2ba   : > { %2492 = vmatpush.msra.mxu3 %v5481_v47  ;;  %2524 = vmatpush.msra.mxu0 %v1780_v63  ;;  %v5490_v47 = vunpack.i.h.bf16 %v5489_v4  ;;  %v3101_v20 = vld [vmem:[%s5352_s1 + $0xc0] sm:$0xff]  ;;  %v1621_v37 = vsel %vm1607_vm9, %v4602_v45, %v1600_v39  ;;  %v1619_v45 = vsel %vm1607_vm9, %v4631_v31, %v1594_v62  ;;  %v3103_v62 = vld [vmem:[%s5352_s1 + $0x110] sm:$0xff] }
 0x2bb   : > { %2471 = vmatmul.f32.gmra.mxu2 %v5482_v48  ;;  %v5095_v43 = vmul.f32 %v3101_v20, %v3784_v11  ;;  %v5495_v11 = vunpack.i.h.bf16 %v4587_v22  ;;  %v3102_v22 = vld [vmem:[%s5352_s1 + $0xe8] sm:$0xff] }
 0x2bc   : > { %2493 = vmatpush.msra.mxu3 %v5485_v61  ;;  %2525 = vmatpush.msra.mxu0 %v1778_v49  ;;  %v1774_v48 = vsel %vm1768_vm6, %v5490_v47, %v3044_v46  ;;  %v5491_v49 = vld [vmem:[#allocation25_spill] sm:$0xff] }
 0x2bd   : > { %v5494_v46 = vld [vmem:[#allocation33_spill] sm:$0xff] }
 0x2be   : > { %v3047_v5 = vpop.permute.xlu1 %3046  ;;  %2494 = vmatpush.msra.mxu3 %v5488_v54  ;;  %2526 = vmatpush.msra.mxu0 %v1776_v17  ;;  %v1900_v17 = vpop.permute.xlu0 %1899 }
 0x2bf   : > { %v3049_v12 = vunpack.i.h.bf16 %v3047_v5  ;;  %v3048_v63 = vunpack.i.l.bf16 %v3047_v5  ;;  %v1623_v5 = vsel %vm1607_vm9, %v4673_v7, %v1606_v8  ;;  %v1927_v7 = vsel %vm1913_vm11, %v4720_v18, %v1906_v50  ;;  %v5496_v8 = vld [vmem:[#allocation35_spill] sm:$0xff]  ;;  %v5191_v50 = vpop.f32.mrf.mxu3 }
 0x2c0   : > { %2495 = vmatpush.msra.mxu3 %v5491_v49  ;;  %2527 = vmatpush.msra.mxu0 %v1774_v48 }
 0x2c1   : > { %2704 = vmatmul.msk.f32.gmra.mxu0 %vm324_vm0, %v5095_v43  ;;  %v1772_v61 = vsel %vm1768_vm6, %v5492_v2, %v3048_v63  ;;  %v1770_v26 = vsel %vm1768_vm6, %v5495_v11, %v3049_v12  ;;  %v5149_v12 = vmul.f32 %v3103_v62, %v3803_v27 }
 0x2c2   : > { %2496 = vmatpush.msra.mxu3 %v5493_v58  ;;  %2528 = vmatpush.msra.mxu0 %v1772_v61 }
 0x2c3   : > { %2474 = vmatmul.f32.gmra.mxu2 %v5494_v46  ;;  %2497 = vmatmul.f32.vlgmr.msra.gmra.mxu3 %v4693_v32  ;;  %v5121_v32 = vmul.f32 %v3102_v22, %v3880_v36  ;;  %v1925_v36 = vsel %vm1913_vm11, %v4892_v51, %v1900_v17 }
 0x2c4   : > { %2529 = vmatpush.msra.mxu0 %v1770_v26 }
 0x2c6   : > { %v1912_v54 = vpop.permute.xlu1 %1911  ;;  %2800 = vmatpush.msk.msra.mxu0 %vm4441_vm8, %v1623_v5  ;;  %v1576_v31 = vpop.permute.xlu0 %1575 }
 0x2c7   : > { %v1929_v63 = vsel %vm1913_vm11, %v4699_v30, %v1912_v54  ;;  %v1582_v30 = vpop.permute.xlu2 %1581  ;;  %v5209_v15 = vpop.f32.mrf.mxu3 }
 0x2c8   : > { %2801 = vmatpush.msk.msra.mxu0 %vm4441_vm8, %v1621_v37  ;;  %2808 = vmatpush.msk.msra.mxu1 %vm4756_vm10, %v1929_v63 }
 0x2c9   : > { %2705 = vmatmul.msk.f32.gmra.mxu0 %vm324_vm0, %v5121_v32 }
 0x2ca   : > { %2802 = vmatpush.msk.msra.mxu0 %vm4441_vm8, %v1619_v45  ;;  %2809 = vmatpush.msk.msra.mxu1 %vm4756_vm10, %v1927_v7 }
 0x2cb   : > { %2477 = vmatmul.f32.gmra.mxu2 %v5496_v8  ;;  %2500 = vmatmul.f32.gmra.mxu3 %v4728_v19  ;;  %v1615_v19 = vsel %vm1607_vm9, %v4653_v34, %v1582_v30  ;;  %v3104_v34 = vld [vmem:[%s5352_s1 + $0x138] sm:$0xff] }
 0x2cc   : > { %2810 = vmatpush.msk.msra.mxu1 %vm4756_vm10, %v1925_v36  ;;  %v5170_v47 = vmul.f32 %v3104_v34, %v3925_v23  ;;  %v5185_v23 = vpop.f32.mrf.mxu2 }
 0x2ce   : > { %v1588_v18 = vpop.permute.xlu1 %1587  ;;  %v1882_v48 = vpop.permute.xlu0 %1881 }
 0x2cf   : > { %v1617_v39 = vsel %vm1607_vm9, %v4745_v28, %v1588_v18  ;;  %v1613_v28 = vsel %vm1607_vm9, %v4826_v14, %v1576_v31  ;;  %v1888_v51 = vpop.permute.xlu2 %1887  ;;  %v1919_v14 = vsel %vm1913_vm11, %v4866_v29, %v1882_v48  ;;  %v5221_v52 = vpop.f32.mrf.mxu3 }
 0x2d0   : > { %2803 = vmatpush.msk.msra.mxu0 %vm4441_vm8, %v1617_v39 }
 0x2d1   : > { %2706 = vmatmul.msk.f32.gmra.mxu0 %vm324_vm0, %v5149_v12 }
 0x2d2   : > { %2804 = vmatpush.msk.msra.mxu0 %vm4441_vm8, %v1615_v19 }
 0x2d3   : > { %2503 = vmatmul.f32.gmra.mxu3 %v4768_v9  ;;  %v1921_v9 = vsel %vm1913_vm11, %v4946_v10, %v1888_v51 }
 0x2d4   : > { %2805 = vmatpush.msk.msra.mxu0 %vm4441_vm8, %v1613_v28  ;;  %v5199_v2 = vpop.f32.mrf.mxu2 }
 0x2d6   : > { %v1894_v27 = vpop.permute.xlu1 %1893 }
 0x2d7   : > { %v1923_v4 = vsel %vm1913_vm11, %v4854_v41, %v1894_v27  ;;  %v1564_v41 = vpop.permute.xlu2 %1563 }
 0x2d8   : > { %2811 = vmatpush.msk.msra.mxu1 %vm4756_vm10, %v1923_v4  ;;  %v1609_v29 = vsel %vm1607_vm9, %v4802_v35, %v1564_v41 }
 0x2d9   : > { %2707 = vmatmul.msk.f32.gmra.mxu0 %vm324_vm0, %v5170_v47 }
 0x2da   : > { %2812 = vmatpush.msk.msra.mxu1 %vm4756_vm10, %v1921_v9 }
 0x2db   : > { %2506 = vmatmul.f32.gmra.mxu3 %v4808_v40  ;;  %v1870_v40 = vpop.permute.xlu0 %1869 }
 0x2dc   : > { %2813 = vmatpush.msk.msra.mxu1 %vm4756_vm10, %v1919_v14  ;;  %v1915_v35 = vsel %vm1913_vm11, %v4980_v56, %v1870_v40 }
 0x2de   : > { %v1570_v20 = vpop.permute.xlu1 %1569 }
 0x2df   : > { %v1611_v10 = vsel %vm1607_vm9, %v4777_v57, %v1570_v20  ;;  %v5237_v58 = vpop.permute.xlu2 %2132 }
 0x2e0   : > { %2806 = vmatpush.msk.msra.mxu0 %vm4441_vm8, %v1611_v10  ;;  %v3107_v10 = vld [vmem:[%s3322_s9 + $0x20] sm:$0xff] }
 0x2e2   : > { %2807 = vmatpush.msk.msra.mxu0 %vm4441_vm8, %v1609_v29 }
 0x2e3   : > { %2509 = vmatmul.f32.gmra.mxu3 %v4850_v3  ;;  %2538 = vmatmul.f32.vlgmr.msra.gmra.mxu0 %v4880_v16  ;;  %v5215_v3 = vpop.f32.mrf.mxu2  ;;  %v2252_v16 = vpop.f32.mrf.mxu1 }
 0x2e4   : > { %v5259_v45 = vpop.permute.xlu0 %2142 }
 0x2e6   : > { %v1876_v49 = vpop.permute.xlu1 %1875 }
 0x2e7   : > { %v1917_v57 = vsel %vm1913_vm11, %v4916_v21, %v1876_v49  ;;  %v2211_v21 = vpop.f32.mrf.mxu0  ;;  %v5268_v28 = vpop.permute.xlu2 %2147 }
 0x2e8   : > { %2814 = vmatpush.msk.msra.mxu1 %vm4756_vm10, %v1917_v57 }
 0x2ea   : > { %2815 = vmatpush.msk.msra.mxu1 %vm4756_vm10, %v1915_v35 }
 0x2eb   : > { %2512 = vmatmul.f32.gmra.mxu3 %v4874_v6  ;;  %2541 = vmatmul.f32.gmra.mxu0 %v4909_v44  ;;  %v5223_v56 = vpop.f32.mrf.mxu2  ;;  %v2255_v6 = vpop.f32.mrf.mxu1 }
 0x2ec   : > { %2708 = vmatmul.msk.f32.vlgmr.msra.gmra.mxu1 %vm324_vm0, %v4988_v60  ;;  %v5229_v44 = vpop.f32.mrf.mxu3 }
 0x2ee   : > { %v5243_v46 = vpop.permute.xlu1 %2137 }
 0x2f3   : > { %2515 = vmatmul.f32.gmra.mxu3 %v4903_v42  ;;  %2544 = vmatmul.f32.gmra.mxu0 %v4935_v33  ;;  %v2214_v42 = vpop.f32.mrf.mxu0  ;;  %v2293_v33 = vpop.f32.mrf.mxu2 }
 0x2f4   : > { %2709 = vmatmul.msk.f32.gmra.mxu1 %vm324_vm0, %v5008_v0  ;;  %v2258_v60 = vpop.f32.mrf.mxu1  ;;  %v2215_v17 = vadd.f32 %v2214_v42, %v5243_v46 }
 0x2f6   : > { %v2256_v37 = vadd.f32 %v2255_v6, %v2215_v17  ;;  %v5274_v41 = vpop.permute.xlu1 %2152 }
 0x2f7   : > { %v2224_v49 = vadd.f32 %v5185_v23, %v5274_v41 }
 0x2fb   : > { %2518 = vmatmul.f32.gmra.mxu3 %v4929_v38  ;;  %2547 = vmatmul.f32.gmra.mxu0 %v4962_v1  ;;  %v2217_v38 = vpop.f32.mrf.mxu0  ;;  %v2296_v1 = vpop.f32.mrf.mxu2 }
 0x2fc   : > { %2710 = vmatmul.msk.f32.gmra.mxu1 %vm324_vm0, %v5040_v59  ;;  %v2261_v59 = vpop.f32.mrf.mxu1  ;;  %v2218_v36 = vadd.f32 %v2217_v38, %v5259_v45  ;;  %v5284_v38 = vpop.permute.xlu0 %2157 }
 0x2fd   : > { %v2227_v23 = vadd.f32 %v5199_v2, %v5284_v38 }
 0x2fe   : > { %v2334_v0 = vpop.f32.mrf.mxu3  ;;  %v2259_v62 = vadd.f32 %v2258_v60, %v2218_v36  ;;  %v3108_v60 = vld [vmem:[%s3322_s9 + $0x30] sm:$0xff] }
 0x303   : > { %2550 = vmatmul.f32.gmra.mxu0 %v4976_v25  ;;  %v2212_v25 = vadd.f32 %v2211_v21, %v5237_v58  ;;  %v2265_v21 = vadd.f32 %v5191_v50, %v2224_v49  ;;  %v2268_v50 = vadd.f32 %v5209_v15, %v2227_v23 }
 0x304   : > { %2711 = vmatmul.msk.f32.gmra.mxu1 %vm324_vm0, %v5070_v24  ;;  %v2220_v24 = vpop.f32.mrf.mxu0 }
 0x305   : > { %v2253_v11 = vadd.f32 %v2252_v16, %v2212_v25  ;;  %v2221_v4 = vadd.f32 %v2220_v24, %v5268_v28 }
 0x306   : > { %v2337_v61 = vpop.f32.mrf.mxu3 }
 0x307   : > { %v2294_v26 = vadd.f32 %v2293_v33, %v2253_v11  ;;  %v2262_v20 = vadd.f32 %v2261_v59, %v2221_v4 }
 0x30b   : > { %2553 = vmatmul.f32.gmra.mxu0 %v4998_v55  ;;  %v2299_v55 = vpop.f32.mrf.mxu2 }
 0x30c   : > { %2712 = vmatmul.msk.f32.gmra.mxu1 %vm324_vm0, %v5095_v43  ;;  %v5245_v43 = vpop.f32.mrf.mxu1  ;;  %v2300_v51 = vadd.f32 %v2299_v55, %v2259_v62  ;;  %v3109_v55 = vld [vmem:[%s3322_s9 + $0x40] sm:$0xff] }
 0x30d   : > { %v2417_v49 = vadd.f32 %v5245_v43, %v5237_v58 }
 0x30e   : > { %v2340_v5 = vpop.f32.mrf.mxu3 }
 0x30f   : > { %v2341_v34 = vadd.f32 %v2340_v5, %v2300_v51 }
 0x313   : > { %2556 = vmatmul.f32.gmra.mxu0 %v5020_v53  ;;  %v2335_v53 = vadd.f32 %v2334_v0, %v2294_v26  ;;  %v2302_v22 = vpop.f32.mrf.mxu2  ;;  %v5291_v26 = vpop.permute.xlu2 %2162 }
 0x314   : > { %2713 = vmatmul.msk.f32.gmra.mxu1 %vm324_vm0, %v5121_v32  ;;  %v3105_v32 = vld [vmem:[%s3322_s9] sm:$0xff]  ;;  %v5264_v30 = vpop.f32.mrf.mxu1  ;;  %v2303_v40 = vadd.f32 %v2302_v22, %v2262_v20  ;;  %v2230_v2 = vadd.f32 %v5215_v3, %v5291_v26 }
 0x316   : > { %v2343_v31 = vpop.f32.mrf.mxu3  ;;  %v2271_v22 = vadd.f32 %v5221_v52, %v2230_v2 }
 0x317   : > { %v2344_v35 = vadd.f32 %v2343_v31, %v2303_v40 }
 0x31b   : > { %2559 = vmatmul.f32.gmra.mxu0 %v5055_v13  ;;  %v2297_v13 = vadd.f32 %v2296_v1, %v2256_v37  ;;  %v2305_v27 = vpop.f32.mrf.mxu2 }
 0x31c   : > { %2714 = vmatmul.msk.f32.gmra.mxu1 %vm324_vm0, %v5149_v12  ;;  %v3106_v12 = vld [vmem:[%s3322_s9 + $0x10] sm:$0xff]  ;;  %v5272_v48 = vpop.f32.mrf.mxu1  ;;  %v2306_v1 = vadd.f32 %v2305_v27, %v2265_v21 }
 0x31d   : > { %v2338_v8 = vadd.f32 %v2337_v61, %v2297_v13  ;;  %v5300_v13 = vpop.permute.xlu1 %2167 }
 0x31e   : > { %v2375_v54 = vpop.f32.mrf.mxu0  ;;  %v2346_v9 = vpop.f32.mrf.mxu3  ;;  %v2233_v31 = vadd.f32 %v5223_v56, %v5300_v13  ;;  %v3112_v56 = vld [vmem:[%s3322_s9 + $0x70] sm:$0xff] }
 0x31f   : > { %v2376_v63 = vadd.f32 %v2375_v54, %v2335_v53  ;;  %v2347_v59 = vadd.f32 %v2346_v9, %v2306_v1 }
 0x320   : > { %v2274_v52 = vadd.f32 %v5229_v44, %v2233_v31 }
 0x321   : > { %v2604_v7 = vadd.f32 %v3105_v32, %v2376_v63  ;;  %v3110_v32 = vld [vmem:[%s3322_s9 + $0x50] sm:$0xff] }
 0x323   : > { %2620 = vst [vmem:[%s5256_s8] sm:$0xff] %v2604_v7  ;;  %v2308_v57 = vpop.f32.mrf.mxu2 }
 0x324   : > { %2715 = vmatmul.msk.f32.gmra.mxu1 %vm324_vm0, %v5170_v47  ;;  %v5281_v42 = vpop.f32.mrf.mxu1  ;;  %v2309_v5 = vadd.f32 %v2308_v57, %v2268_v50 }
 0x326   : > { %v2378_v18 = vpop.f32.mrf.mxu0  ;;  %v2349_v33 = vpop.f32.mrf.mxu3 }
 0x327   : > { %v2379_v39 = vadd.f32 %v2378_v18, %v2338_v8  ;;  %v2350_v54 = vadd.f32 %v2349_v33, %v2309_v5 }
 0x329   : > { %v2606_v19 = vadd.f32 %v3106_v12, %v2379_v39  ;;  %v3111_v12 = vld [vmem:[%s3322_s9 + $0x60] sm:$0xff] }
 0x32b   : > { %2622 = vst [vmem:[%s5256_s8 + $0x10] sm:$0xff] %v2606_v19  ;;  %v2311_v25 = vpop.f32.mrf.mxu2 }
 0x32c   : > { %v5293_v17 = vpop.f32.mrf.mxu1  ;;  %v2312_v36 = vadd.f32 %v2311_v25, %v2271_v22  ;;  %v2426_v22 = vadd.f32 %v5281_v42, %v5268_v28  ;;  %v3116_v28 = vld [vmem:[%s3322_s9 + $0x38] sm:$0xff] }
 0x32e   : > { %v2381_v47 = vpop.f32.mrf.mxu0  ;;  %v2352_v53 = vpop.f32.mrf.mxu3 }
 0x32f   : > { %v2382_v14 = vadd.f32 %v2381_v47, %v2341_v34  ;;  %v2353_v3 = vadd.f32 %v2352_v53, %v2312_v36 }
 0x331   : > { %v2608_v29 = vadd.f32 %v3107_v10, %v2382_v14 }
 0x333   : > { %2624 = vst [vmem:[%s5256_s8 + $0x20] sm:$0xff] %v2608_v29  ;;  %v2314_v15 = vpop.f32.mrf.mxu2 }
 0x334   : > { %v5303_v8 = vpop.f32.mrf.mxu1  ;;  %v2315_v51 = vadd.f32 %v2314_v15, %v2274_v52 }
 0x336   : > { %v2384_v16 = vpop.f32.mrf.mxu0  ;;  %v2355_v18 = vpop.f32.mrf.mxu3 }
 0x337   : > { %v2385_v6 = vadd.f32 %v2384_v16, %v2344_v35  ;;  %v2356_v4 = vadd.f32 %v2355_v18, %v2315_v51 }
 0x339   : > { %v2610_v0 = vadd.f32 %v3108_v60, %v2385_v6 }
 0x33b   : > { %2626 = vst [vmem:[%s5256_s8 + $0x30] sm:$0xff] %v2610_v0  ;;  %v2457_v27 = vpop.f32.mrf.mxu2  ;;  %v2420_v0 = vadd.f32 %v5264_v30, %v5243_v46  ;;  %v3114_v46 = vld [vmem:[%s3322_s9 + $0x18] sm:$0xff] }
 0x33c   : > { %v5310_v9 = vpop.f32.mrf.mxu1  ;;  %v2458_v57 = vadd.f32 %v2457_v27, %v2417_v49 }
 0x33e   : > { %v2387_v61 = vpop.f32.mrf.mxu0 }
 0x33f   : > { %v2388_v24 = vadd.f32 %v2387_v61, %v2347_v59  ;;  %v3113_v59 = vld [vmem:[%s3322_s9 + $0x8] sm:$0xff] }
 0x341   : > { %v2612_v11 = vadd.f32 %v3109_v55, %v2388_v24  ;;  %v2423_v55 = vadd.f32 %v5272_v48, %v5259_v45  ;;  %v3115_v45 = vld [vmem:[%s3322_s9 + $0x28] sm:$0xff] }
 0x343   : > { %2628 = vst [vmem:[%s5256_s8 + $0x40] sm:$0xff] %v2612_v11  ;;  %v2460_v10 = vpop.f32.mrf.mxu2 }
 0x344   : > { %v5314_v44 = vpop.f32.mrf.mxu1  ;;  %v2461_v23 = vadd.f32 %v2460_v10, %v2420_v0 }
 0x346   : > { %v2390_v37 = vpop.f32.mrf.mxu0  ;;  %v2498_v34 = vpop.f32.mrf.mxu3 }
 0x347   : > { %v2391_v63 = vadd.f32 %v2390_v37, %v2350_v54  ;;  %v2499_v35 = vadd.f32 %v2498_v34, %v2458_v57 }
 0x349   : > { %v2614_v7 = vadd.f32 %v3110_v32, %v2391_v63 }
 0x34b   : > { %2630 = vst [vmem:[%s5256_s8 + $0x50] sm:$0xff] %v2614_v7  ;;  %v2463_v16 = vpop.f32.mrf.mxu2 }
 0x34c   : > { %v2464_v53 = vadd.f32 %v2463_v16, %v2423_v55 }
 0x34e   : > { %v2393_v39 = vpop.f32.mrf.mxu0  ;;  %v2501_v29 = vpop.f32.mrf.mxu3 }
 0x34f   : > { %v2394_v62 = vadd.f32 %v2393_v39, %v2353_v3  ;;  %v2502_v25 = vadd.f32 %v2501_v29, %v2461_v23  ;;  %v2438_v23 = vadd.f32 %v5314_v44, %v5300_v13 }
 0x351   : > { %v2616_v19 = vadd.f32 %v3111_v12, %v2394_v62  ;;  %v2429_v62 = vadd.f32 %v5293_v17, %v5274_v41  ;;  %v3117_v41 = vld [vmem:[%s3322_s9 + $0x48] sm:$0xff] }
 0x353   : > { %2632 = vst [vmem:[%s5256_s8 + $0x60] sm:$0xff] %v2616_v19  ;;  %v2466_v43 = vpop.f32.mrf.mxu2 }
 0x354   : > { %v2467_v7 = vadd.f32 %v2466_v43, %v2426_v22 }
 0x356   : > { %v2396_v47 = vpop.f32.mrf.mxu0  ;;  %v2504_v33 = vpop.f32.mrf.mxu3 }
 0x357   : > { %v2397_v14 = vadd.f32 %v2396_v47, %v2356_v4  ;;  %v2505_v2 = vadd.f32 %v2504_v33, %v2464_v53 }
 0x359   : > { %v2618_v20 = vadd.f32 %v3112_v56, %v2397_v14  ;;  %v2432_v14 = vadd.f32 %v5303_v8, %v5284_v38  ;;  %v3118_v38 = vld [vmem:[%s3322_s9 + $0x58] sm:$0xff] }
 0x35b   : > { %2634 = vst [vmem:[%s5256_s8 + $0x70] sm:$0xff] %v2618_v20  ;;  %v2469_v32 = vpop.f32.mrf.mxu2 }
 0x35c   : > { %v2470_v12 = vadd.f32 %v2469_v32, %v2429_v62 }
 0x35e   : > { %v2507_v5 = vpop.f32.mrf.mxu3 }
 0x35f   : > { %v2508_v31 = vadd.f32 %v2507_v5, %v2467_v7 }
 0x360   : > { %v2539_v40 = vpop.f32.mrf.mxu0 }
 0x361   : > { %v2540_v21 = vadd.f32 %v2539_v40, %v2499_v35  ;;  %v2435_v35 = vadd.f32 %v5310_v9, %v5291_v26  ;;  %v3119_v26 = vld [vmem:[%s3322_s9 + $0x68] sm:$0xff] }
 0x363   : > { %v2472_v19 = vpop.f32.mrf.mxu2 }
 0x364   : > { %v2473_v20 = vadd.f32 %v2472_v19, %v2432_v14 }
 0x366   : > { %v2510_v36 = vpop.f32.mrf.mxu3 }
 0x367   : > { %v2511_v51 = vadd.f32 %v2510_v36, %v2470_v12 }
 0x368   : > { %v2542_v6 = vpop.f32.mrf.mxu0 }
 0x369   : > { %v2580_v60 = vpop.f32.mrf.mxu1  ;;  %v2543_v24 = vadd.f32 %v2542_v6, %v2502_v25 }
 0x36a   : > { %v2581_v1 = vadd.f32 %v2580_v60, %v2540_v21 }
 0x36b   : > { %v2475_v29 = vpop.f32.mrf.mxu2 }
 0x36c   : > { %v2605_v61 = vadd.f32 %v3113_v59, %v2581_v1  ;;  %v2476_v6 = vadd.f32 %v2475_v29, %v2435_v35 }
 0x36e   : > { %2621 = vst [vmem:[%s5256_s8 + $0x8] sm:$0xff] %v2605_v61  ;;  %v2513_v27 = vpop.f32.mrf.mxu3 }
 0x36f   : > { %v2514_v10 = vadd.f32 %v2513_v27, %v2473_v20 }
 0x370   : > { %v2545_v58 = vpop.f32.mrf.mxu0 }
 0x371   : > { %v2583_v50 = vpop.f32.mrf.mxu1  ;;  %v2546_v54 = vadd.f32 %v2545_v58, %v2505_v2 }
 0x372   : > { %v2584_v11 = vadd.f32 %v2583_v50, %v2543_v24 }
 0x373   : > { %v2478_v0 = vpop.f32.mrf.mxu2 }
 0x374   : > { %v2607_v30 = vadd.f32 %v3114_v46, %v2584_v11  ;;  %v2479_v25 = vadd.f32 %v2478_v0, %v2438_v23  ;;  %v3120_v11 = vld [vmem:[%s3322_s9 + $0x78] sm:$0xff] }
 0x376   : > { %2623 = vst [vmem:[%s5256_s8 + $0x18] sm:$0xff] %v2607_v30  ;;  %v2516_v49 = vpop.f32.mrf.mxu3 }
 0x377   : > { %v2517_v33 = vadd.f32 %v2516_v49, %v2476_v6 }
 0x378   : > { %v2548_v37 = vpop.f32.mrf.mxu0 }
 0x379   : > { %v2586_v63 = vpop.f32.mrf.mxu1  ;;  %v2549_v3 = vadd.f32 %v2548_v37, %v2508_v31 }
 0x37a   : > { %v2587_v15 = vadd.f32 %v2586_v63, %v2546_v54 }
 0x37c   : > { %v2609_v48 = vadd.f32 %v3115_v45, %v2587_v15 }
 0x37e   : > { %2625 = vst [vmem:[%s5256_s8 + $0x28] sm:$0xff] %v2609_v48  ;;  %v2519_v61 = vpop.f32.mrf.mxu3 }
 0x37f   : > { %v2520_v58 = vadd.f32 %v2519_v61, %v2479_v25 }
 0x380   : > { %v2551_v18 = vpop.f32.mrf.mxu0 }
 0x381   : > { %v2589_v39 = vpop.f32.mrf.mxu1  ;;  %v2552_v4 = vadd.f32 %v2551_v18, %v2511_v51 }
 0x382   : > { %v2590_v52 = vadd.f32 %v2589_v39, %v2549_v3 }
 0x384   : > { %v2611_v42 = vadd.f32 %v3116_v28, %v2590_v52 }
 0x386   : > { %2627 = vst [vmem:[%s5256_s8 + $0x38] sm:$0xff] %v2611_v42 }
 0x388   : > { %v2554_v34 = vpop.f32.mrf.mxu0 }
 0x389   : > { %v2592_v47 = vpop.f32.mrf.mxu1  ;;  %v2555_v40 = vadd.f32 %v2554_v34, %v2514_v10 }
 0x38a   : > { %v2593_v56 = vadd.f32 %v2592_v47, %v2552_v4 }
 0x38c   : > { %v2613_v17 = vadd.f32 %v3117_v41, %v2593_v56 }
 0x38e   : > { %2629 = vst [vmem:[%s5256_s8 + $0x48] sm:$0xff] %v2613_v17 }
 0x390   : > { %v2557_v21 = vpop.f32.mrf.mxu0 }
 0x391   : > { %v2595_v57 = vpop.f32.mrf.mxu1  ;;  %v2558_v60 = vadd.f32 %v2557_v21, %v2517_v33 }
 0x392   : > { %v2596_v16 = vadd.f32 %v2595_v57, %v2555_v40 }
 0x394   : > { %v2615_v8 = vadd.f32 %v3118_v38, %v2596_v16 }
 0x396   : > { %2631 = vst [vmem:[%s5256_s8 + $0x58] sm:$0xff] %v2615_v8 }
 0x398   : > { %v2560_v24 = vpop.f32.mrf.mxu0 }
 0x399   : > { %v2598_v1 = vpop.f32.mrf.mxu1  ;;  %v2561_v43 = vadd.f32 %v2560_v24, %v2520_v58 }
 0x39a   : > { %v2599_v59 = vadd.f32 %v2598_v1, %v2558_v60 }
 0x39c   : > { %v2617_v9 = vadd.f32 %v3119_v26, %v2599_v59 }
 0x39e   : > { %2633 = vst [vmem:[%s5256_s8 + $0x68] sm:$0xff] %v2617_v9 }
 0x3a1   : > { %v2601_v50 = vpop.f32.mrf.mxu1 }
 0x3a2   : > { %v2602_v55 = vadd.f32 %v2601_v50, %v2561_v43 }
 0x3a4   : > { %v2619_v5 = vadd.f32 %v3120_v11, %v2602_v55 }
 0x3a6   : > { %2635 = vst [vmem:[%s5256_s8 + $0x78] sm:$0xff] %v2619_v5 }
 0x3a7 PF: > { %s15_s18 = sadd.s32 1, %s3127_s18  }
 0x3a8   : > { %p12_p4 = scmp.ge.s32.totalorder %s15_s18, 4  }
 0x3aa   :  { %14 = sbr.rel (!%p12_p4) target bundleno = 1 (0x1), region = 70 }

</bundles_post_ra>
